<compile_context>
chip_gen: v7x
topology: tpu7x:2x2x1
jax: 0.10.0
libtpu: 0.0.40
codegen_flags: <defaults>
</compile_context>

<pallas_src>
import functools

import jax
import jax.numpy as jnp
from jax.experimental import pallas as pl
from jax.experimental.pallas import tpu as pltpu


def encoder_kernel(
    x_ref, w1_ref, b1_ref, w2_ref, b2_ref, wh_ref, bh_ref, eps_ref,
    out_ref,
):
    latent_dim = eps_ref.shape[-1]

    # in-kernel bf16 cast of the batch tile (halves x HBM traffic vs. a
    # wrapper-side cast; VPU work hides under the tile DMA)
    x = x_ref[...].astype(w1_ref.dtype)

    # hidden layer 1: Linear(input_dim, 256) + ReLU   (bf16 MXU, f32 accum)
    h1 = jnp.dot(x, w1_ref[...], preferred_element_type=jnp.float32) + b1_ref[...]
    h1 = jnp.maximum(h1, 0.0)

    # hidden layer 2: Linear(256, 128) + ReLU
    h2 = jnp.dot(h1.astype(w2_ref.dtype), w2_ref[...],
                 preferred_element_type=jnp.float32) + b2_ref[...]
    h2 = jnp.maximum(h2, 0.0)

    # fused heads: one matmul producing [mu | log_var] on the lane axis
    y = jnp.dot(h2.astype(wh_ref.dtype), wh_ref[...],
                preferred_element_type=jnp.float32) + bh_ref[...]
    mu = y[:, :latent_dim]
    log_var = y[:, latent_dim:]

    # reparameterize: z = mu + eps * exp(0.5 * log_var)  (EUP exp, f32 VPU math)
    std = jnp.exp(log_var * 0.5)
    z = mu + eps_ref[...] * std

    # lane-dense packed output: [mu | log_var | z | zero-pad] up to 128 lanes
    rows = y.shape[0]
    pad = out_ref.shape[-1] - 3 * latent_dim
    pieces = [y, z]
    if pad > 0:
        pieces.append(jnp.zeros((rows, pad), jnp.float32))
    out_ref[...] = jnp.concatenate(pieces, axis=-1).astype(out_ref.dtype)


def _default_batch_tile(B):
    # Launch/DMA-latency bound at these sizes: single grid step up to 1024 rows
    # (no benefit from splitting on single-TC v5e/v6e; v7x's 2-TC win only pays
    # once each tile is >= ~512 rows). Larger B: 1024-row tiles amortize the
    # ~0.35us/step overhead and shard cleanly across v7x TensorCores.
    if B <= 1024:
        return B
    return 1024


def pack_params(params):
    """One-time param prep (hoisted out of the per-call forward):
    bf16 MXU weights + fused [mu|log_var] head weight/bias."""
    return dict(
        w1=params["w1"].astype(jnp.bfloat16),
        b1=params["b1"].astype(jnp.float32),
        w2=params["w2"].astype(jnp.bfloat16),
        b2=params["b2"].astype(jnp.float32),
        wh=jnp.concatenate([params["wmu"], params["wlv"]], axis=1).astype(jnp.bfloat16),
        bh=jnp.concatenate([params["bmu"], params["blv"]], axis=1).astype(jnp.float32),
        latent_dim=params["wmu"].shape[1],
    )


@functools.partial(jax.jit, static_argnames=("batch_tile",))
def encoder_forward(x, packed, eps, *, batch_tile=None):
    B, input_dim = x.shape
    latent_dim = eps.shape[1]
    h1_dim = packed["w1"].shape[1]
    h2_dim = packed["w2"].shape[1]

    if batch_tile is None:
        batch_tile = _default_batch_tile(B)
    batch_tile = min(batch_tile, B)

    grid = (pl.cdiv(B, batch_tile),)

    # lane-dense output width (>=128, multiple of 128): [mu | log_var | z | pad]
    out_lanes = max(128, ((3 * latent_dim + 127) // 128) * 128)

    x_spec = pl.BlockSpec((batch_tile, input_dim), lambda i: (i, 0))
    eps_spec = pl.BlockSpec((batch_tile, latent_dim), lambda i: (i, 0))
    out_spec = pl.BlockSpec((batch_tile, out_lanes), lambda i: (i, 0))

    def full_spec(shape):
        # replicated (same block every grid step)
        return pl.BlockSpec(shape, lambda i: (0, 0))

    in_specs = [
        x_spec,
        full_spec((input_dim, h1_dim)),
        full_spec((1, h1_dim)),
        full_spec((h1_dim, h2_dim)),
        full_spec((1, h2_dim)),
        full_spec((h2_dim, 2 * latent_dim)),
        full_spec((1, 2 * latent_dim)),
        eps_spec,
    ]

    weight_bytes = 2 * (input_dim * h1_dim + h1_dim * h2_dim + h2_dim * 2 * latent_dim)
    bias_bytes = 4 * (h1_dim + h2_dim + 2 * latent_dim)
    cost = pl.CostEstimate(
        flops=2 * B * (input_dim * h1_dim + h1_dim * h2_dim + h2_dim * 2 * latent_dim)
        + 4 * B * latent_dim,
        transcendentals=B * latent_dim,
        bytes_accessed=4 * B * input_dim + 4 * B * latent_dim
        + weight_bytes + bias_bytes + 4 * B * out_lanes,
    )

    out = pl.pallas_call(
        encoder_kernel,
        out_shape=jax.ShapeDtypeStruct((B, out_lanes), jnp.float32),
        grid_spec=pl.GridSpec(
            grid=grid,
            in_specs=in_specs,
            out_specs=out_spec,
        ),
        compiler_params=pltpu.CompilerParams(
            dimension_semantics=("parallel",),
            vmem_limit_bytes=32 * 1024 * 1024,
        ),
        cost_estimate=cost,
    )(
        x,
        packed["w1"], packed["b1"],
        packed["w2"], packed["b2"],
        packed["wh"], packed["bh"],
        eps,
    )

    mu = out[:, :latent_dim]
    log_var = out[:, latent_dim:2 * latent_dim]
    z = out[:, 2 * latent_dim:3 * latent_dim]
    return z, mu, log_var


def init_params(key, input_dim, latent_dim):
    """Deterministic init mirroring nn.Linear shapes (weights stored (in, out))."""
    h1, h2 = 256, 128
    keys = jax.random.split(key, 8)

    def linear(kw, kb, fan_in, fan_out):
        # Uniform(-1/sqrt(fan_in), 1/sqrt(fan_in)) like PyTorch's default init.
        bound = 1.0 / jnp.sqrt(fan_in)
        w = jax.random.uniform(kw, (fan_in, fan_out), jnp.float32, -bound, bound)
        b = jax.random.uniform(kb, (1, fan_out), jnp.float32, -bound, bound)
        return w, b

    w1, b1 = linear(keys[0], keys[1], input_dim, h1)
    w2, b2 = linear(keys[2], keys[3], h1, h2)
    wmu, bmu = linear(keys[4], keys[5], h2, latent_dim)
    wlv, blv = linear(keys[6], keys[7], h2, latent_dim)
    return dict(w1=w1, b1=b1, w2=w2, b2=b2, wmu=wmu, bmu=bmu, wlv=wlv, blv=blv)


def reference_forward(x, params, eps):
    """Pure-JAX reference of the PyTorch module's forward (mirrors bf16 MXU operands)."""
    bf = jnp.bfloat16
    h1 = jnp.maximum(
        jnp.dot(x.astype(bf), params["w1"].astype(bf),
                preferred_element_type=jnp.float32) + params["b1"], 0.0)
    h2 = jnp.maximum(
        jnp.dot(h1.astype(bf), params["w2"].astype(bf),
                preferred_element_type=jnp.float32) + params["b2"], 0.0)
    mu = jnp.dot(h2.astype(bf), params["wmu"].astype(bf),
                 preferred_element_type=jnp.float32) + params["bmu"]
    log_var = jnp.dot(h2.astype(bf), params["wlv"].astype(bf),
                      preferred_element_type=jnp.float32) + params["blv"]
    z = mu + eps * jnp.exp(0.5 * log_var)
    return z, mu, log_var


if __name__ == "__main__":
    input_dim = 64
    latent_dim = 16
    batch = 256

    key = jax.random.PRNGKey(0)
    kx, kparams, keps = jax.random.split(key, 3)

    x = jax.random.normal(kx, (batch, input_dim), jnp.float32)
    params = init_params(kparams, input_dim, latent_dim)
    eps = jax.random.normal(keps, (batch, latent_dim), jnp.float32)

    packed = pack_params(params)  # one-time weight prep, not in the hot path

    z, mu, log_var = encoder_forward(x, packed, eps)
    jax.block_until_ready((z, mu, log_var))

    z_ref, mu_ref, lv_ref = reference_forward(x, params, eps)
    assert jnp.allclose(mu, mu_ref, atol=5e-3, rtol=5e-3)
    assert jnp.allclose(log_var, lv_ref, atol=5e-3, rtol=5e-3)
    assert jnp.allclose(z, z_ref, atol=5e-3, rtol=5e-3)

    print("KERNEL_OK")
</pallas_src>

<mosaic_0001>
module attributes {stable_mosaic.version = 11 : i64} {
  func.func @encoder_kernel(%arg0: i32, %arg1: memref<256x64xf32, #tpu.memory_space<vmem>>, %arg2: memref<64x256xbf16, #tpu.memory_space<vmem>>, %arg3: memref<1x256xf32, #tpu.memory_space<vmem>>, %arg4: memref<256x128xbf16, #tpu.memory_space<vmem>>, %arg5: memref<1x128xf32, #tpu.memory_space<vmem>>, %arg6: memref<128x32xbf16, #tpu.memory_space<vmem>>, %arg7: memref<1x32xf32, #tpu.memory_space<vmem>>, %arg8: memref<256x16xf32, #tpu.memory_space<vmem>>, %arg9: memref<256x128xf32, #tpu.memory_space<vmem>>) attributes {dimension_semantics = [#tpu.dimension_semantics<parallel>], iteration_bounds = array<i64: 1>, scalar_prefetch = 0 : i64, scratch_operands = 0 : i64, tpu.core_type = #tpu.core_type<tc>, window_params = [{transform_indices = @transform_0, window_bounds = array<i64: 256, 64>}, {pipeline_mode = #tpu.pipeline_mode<synchronous>, transform_indices = @transform_1, window_bounds = array<i64: 64, 256>}, {pipeline_mode = #tpu.pipeline_mode<synchronous>, transform_indices = @transform_2, window_bounds = array<i64: 1, 256>}, {pipeline_mode = #tpu.pipeline_mode<synchronous>, transform_indices = @transform_3, window_bounds = array<i64: 256, 128>}, {pipeline_mode = #tpu.pipeline_mode<synchronous>, transform_indices = @transform_4, window_bounds = array<i64: 1, 128>}, {pipeline_mode = #tpu.pipeline_mode<synchronous>, transform_indices = @transform_5, window_bounds = array<i64: 128, 32>}, {pipeline_mode = #tpu.pipeline_mode<synchronous>, transform_indices = @transform_6, window_bounds = array<i64: 1, 32>}, {transform_indices = @transform_7, window_bounds = array<i64: 256, 16>}, {transform_indices = @transform_8, window_bounds = array<i64: 256, 128>}]} {
    %c0 = arith.constant 0 : index
    %c0_0 = arith.constant 0 : index
    %0 = vector.load %arg1[%c0, %c0_0] : memref<256x64xf32, #tpu.memory_space<vmem>>, vector<256x64xf32>
    %1 = arith.truncf %0 : vector<256x64xf32> to vector<256x64xbf16>
    %c0_1 = arith.constant 0 : index
    %c0_2 = arith.constant 0 : index
    %2 = vector.load %arg2[%c0_1, %c0_2] : memref<64x256xbf16, #tpu.memory_space<vmem>>, vector<64x256xbf16>
    %cst = arith.constant dense<0.000000e+00> : vector<256x256xf32>
    %3 = tpu.matmul %1, %2, %cst {dimension_numbers = #tpu.dot_dimension_numbers<[1], [0], [0], [1], [0, 0, 1, 1], [], []>} : vector<256x64xbf16>, vector<64x256xbf16>, vector<256x256xf32> -> vector<256x256xf32>
    %c0_3 = arith.constant 0 : index
    %c0_4 = arith.constant 0 : index
    %4 = vector.load %arg3[%c0_3, %c0_4] : memref<1x256xf32, #tpu.memory_space<vmem>>, vector<1x256xf32>
    %5 = vector.broadcast %4 : vector<1x256xf32> to vector<256x256xf32>
    %6 = arith.addf %3, %5 : vector<256x256xf32>
    %cst_5 = arith.constant 0.000000e+00 : f32
    %7 = vector.broadcast %cst_5 : f32 to vector<256x256xf32>
    %8 = arith.maximumf %6, %7 : vector<256x256xf32>
    %9 = arith.truncf %8 : vector<256x256xf32> to vector<256x256xbf16>
    %c0_6 = arith.constant 0 : index
    %c0_7 = arith.constant 0 : index
    %10 = vector.load %arg4[%c0_6, %c0_7] : memref<256x128xbf16, #tpu.memory_space<vmem>>, vector<256x128xbf16>
    %cst_8 = arith.constant dense<0.000000e+00> : vector<256x128xf32>
    %11 = tpu.matmul %9, %10, %cst_8 {dimension_numbers = #tpu.dot_dimension_numbers<[1], [0], [0], [1], [0, 0, 1, 1], [], []>} : vector<256x256xbf16>, vector<256x128xbf16>, vector<256x128xf32> -> vector<256x128xf32>
    %c0_9 = arith.constant 0 : index
    %c0_10 = arith.constant 0 : index
    %12 = vector.load %arg5[%c0_9, %c0_10] : memref<1x128xf32, #tpu.memory_space<vmem>>, vector<1x128xf32>
    %13 = vector.broadcast %12 : vector<1x128xf32> to vector<256x128xf32>
    %14 = arith.addf %11, %13 : vector<256x128xf32>
    %cst_11 = arith.constant 0.000000e+00 : f32
    %15 = vector.broadcast %cst_11 : f32 to vector<256x128xf32>
    %16 = arith.maximumf %14, %15 : vector<256x128xf32>
    %17 = arith.truncf %16 : vector<256x128xf32> to vector<256x128xbf16>
    %c0_12 = arith.constant 0 : index
    %c0_13 = arith.constant 0 : index
    %18 = vector.load %arg6[%c0_12, %c0_13] : memref<128x32xbf16, #tpu.memory_space<vmem>>, vector<128x32xbf16>
    %cst_14 = arith.constant dense<0.000000e+00> : vector<256x32xf32>
    %19 = tpu.matmul %17, %18, %cst_14 {dimension_numbers = #tpu.dot_dimension_numbers<[1], [0], [0], [1], [0, 0, 1, 1], [], []>} : vector<256x128xbf16>, vector<128x32xbf16>, vector<256x32xf32> -> vector<256x32xf32>
    %c0_15 = arith.constant 0 : index
    %c0_16 = arith.constant 0 : index
    %20 = vector.load %arg7[%c0_15, %c0_16] : memref<1x32xf32, #tpu.memory_space<vmem>>, vector<1x32xf32>
    %21 = vector.broadcast %20 : vector<1x32xf32> to vector<256x32xf32>
    %22 = arith.addf %19, %21 : vector<256x32xf32>
    %23 = vector.extract_strided_slice %22 {offsets = [0, 0], sizes = [256, 16], strides = [1, 1]} : vector<256x32xf32> to vector<256x16xf32>
    %24 = vector.extract_strided_slice %22 {offsets = [0, 16], sizes = [256, 16], strides = [1, 1]} : vector<256x32xf32> to vector<256x16xf32>
    %cst_17 = arith.constant 5.000000e-01 : f32
    %25 = vector.broadcast %cst_17 : f32 to vector<256x16xf32>
    %26 = arith.mulf %24, %25 : vector<256x16xf32>
    %27 = math.exp %26 : vector<256x16xf32>
    %c0_18 = arith.constant 0 : index
    %c0_19 = arith.constant 0 : index
    %28 = vector.load %arg8[%c0_18, %c0_19] : memref<256x16xf32, #tpu.memory_space<vmem>>, vector<256x16xf32>
    %29 = arith.mulf %28, %27 : vector<256x16xf32>
    %30 = arith.addf %23, %29 : vector<256x16xf32>
    %cst_20 = arith.constant 0.000000e+00 : f32
    %31 = vector.broadcast %cst_20 : f32 to vector<256x80xf32>
    %32 = tpu.concatenate %22, %30, %31 in 1 : vector<256x32xf32>, vector<256x16xf32>, vector<256x80xf32> -> vector<256x128xf32>
    %c0_21 = arith.constant 0 : index
    %c0_22 = arith.constant 0 : index
    %33 = vector.load %arg9[%c0_21, %c0_22] : memref<256x128xf32, #tpu.memory_space<vmem>>, vector<256x128xf32>
    tpu.vector_store %arg9[%c0_21, %c0_22], %32 {strides = array<i32>} : memref<256x128xf32, #tpu.memory_space<vmem>>, vector<256x128xf32>,
    return
  }
  func.func @transform_0(%arg0: i32) -> (i32, i32) {
    %c0_i32 = arith.constant 0 : i32
    %c0_i32_0 = arith.constant 0 : i32
    return %arg0, %c0_i32 : i32, i32
  }
  func.func @transform_1(%arg0: i32) -> (i32, i32) {
    %c0_i32 = arith.constant 0 : i32
    %c0_i32_0 = arith.constant 0 : i32
    %c0_i32_1 = arith.constant 0 : i32
    return %c0_i32, %c0_i32_0 : i32, i32
  }
  func.func @transform_2(%arg0: i32) -> (i32, i32) {
    %c0_i32 = arith.constant 0 : i32
    %c0_i32_0 = arith.constant 0 : i32
    %c0_i32_1 = arith.constant 0 : i32
    return %c0_i32, %c0_i32_0 : i32, i32
  }
  func.func @transform_3(%arg0: i32) -> (i32, i32) {
    %c0_i32 = arith.constant 0 : i32
    %c0_i32_0 = arith.constant 0 : i32
    %c0_i32_1 = arith.constant 0 : i32
    return %c0_i32, %c0_i32_0 : i32, i32
  }
  func.func @transform_4(%arg0: i32) -> (i32, i32) {
    %c0_i32 = arith.constant 0 : i32
    %c0_i32_0 = arith.constant 0 : i32
    %c0_i32_1 = arith.constant 0 : i32
    return %c0_i32, %c0_i32_0 : i32, i32
  }
  func.func @transform_5(%arg0: i32) -> (i32, i32) {
    %c0_i32 = arith.constant 0 : i32
    %c0_i32_0 = arith.constant 0 : i32
    %c0_i32_1 = arith.constant 0 : i32
    return %c0_i32, %c0_i32_0 : i32, i32
  }
  func.func @transform_6(%arg0: i32) -> (i32, i32) {
    %c0_i32 = arith.constant 0 : i32
    %c0_i32_0 = arith.constant 0 : i32
    %c0_i32_1 = arith.constant 0 : i32
    return %c0_i32, %c0_i32_0 : i32, i32
  }
  func.func @transform_7(%arg0: i32) -> (i32, i32) {
    %c0_i32 = arith.constant 0 : i32
    %c0_i32_0 = arith.constant 0 : i32
    return %arg0, %c0_i32 : i32, i32
  }
  func.func @transform_8(%arg0: i32) -> (i32, i32) {
    %c0_i32 = arith.constant 0 : i32
    %c0_i32_0 = arith.constant 0 : i32
    return %arg0, %c0_i32 : i32, i32
  }
}

</mosaic_0001>

<bundles_post_ra>
// kernel: encoder_forward.1
= control target key start
LH: loop header
LB: loop body
LE: loop exit
PB: predicated region body
PF: predicated region fallthrough
CT: control target
= control target key end

     0   :  { %v1947_v1 = vmov 0   ;;  %vm138_vm0 = vcmask 523264   ;;  %vm1500_vm1 = vcmask 261120   ;;  %vm1533_vm2 = vcmask 392192   ;;  %s2868_s1 = inlined_call_operand.vmem [shape: bf16[64,256], index: 1, kind: input, shape index: {}]   ;;  %s2869_s0 = inlined_call_operand.vmem [shape: f32[256,64], index: 0, kind: input, shape index: {}]   ;;  %s2870_s3 = inlined_call_operand.vmem [shape: bf16[256,128], index: 3, kind: input, shape index: {}]   ;;  %s2871_s2 = inlined_call_operand.vmem [shape: f32[1,256], index: 2, kind: input, shape index: {}]   ;;  %s2872_s5 = inlined_call_operand.vmem [shape: bf16[128,32], index: 5, kind: input, shape index: {}]   ;;  %s2873_s4 = inlined_call_operand.vmem [shape: f32[1,128], index: 4, kind: input, shape index: {}]   ;;  %s2874_s6 = inlined_call_operand.vmem [shape: f32[1,32], index: 6, kind: input, shape index: {}]   ;;  %s2875_s7 = inlined_call_operand.vmem [shape: f32[256,16], index: 7, kind: input, shape index: {}]   ;;  %s2876_s8 = inlined_call_operand.vmem [shape: f32[256,128], index: 8, kind: output, shape index: {}]  }
   0x1   :  { %v1847_v0 = vld [vmem:[%s2868_s1 + $0x4] ss:$8 sps:$4 sm:$0xff]   ;;  %219 = vmatprep.mubr.bf16.mxu0 %v1947_v1  ;;  %339 = vmatprep.mubr.bf16.mxu1 %v1947_v1  ;;  %v1849_v2 = vld [vmem:[%s2868_s1] ss:$8 sps:$4 sm:$0xff]   ;;  %v1850_v3 = vld [vmem:[%s2868_s1 + $0x14] ss:$8 sps:$4 sm:$0xff]  }
   0x2   :  { %187 = vmatprep.subr.bf16.mxu0 %v1847_v0  ;;  %1836 = vmatprep.subr.bf16.mxu1 %v1847_v0  ;;  %v1852_v4 = vld [vmem:[%s2868_s1 + $0x10] ss:$8 sps:$4 sm:$0xff]   ;;  %v1853_v5 = vld [vmem:[%s2868_s1 + $0x24] ss:$8 sps:$4 sm:$0xff]   ;;  %v1855_v6 = vld [vmem:[%s2868_s1 + $0x20] ss:$8 sps:$4 sm:$0xff]  }
   0x3   :  { %188 = vmatpush1.bf16.msra.mxu0 %v1849_v2  ;;  %1840 = vmatpush1.bf16.msra.mxu1 %v1849_v2  ;;  %v1856_v7 = vld [vmem:[%s2868_s1 + $0x34] ss:$8 sps:$4 sm:$0xff]   ;;  %v1858_v8 = vld [vmem:[%s2868_s1 + $0x30] ss:$8 sps:$4 sm:$0xff]   ;;  %v30_v9 = vld [vmem:[%s2869_s0] sm:$0xff] }
   0x4   :  { %189 = vmatprep.subr.bf16.mxu0 %v1850_v3  ;;  %1837 = vmatprep.subr.bf16.mxu1 %v1850_v3  ;;  %v31_v10 = vld [vmem:[%s2869_s0 + $0x8] sm:$0xff]  ;;  %v54_v11 = vld [vmem:[%s2869_s0 + $0xc0] sm:$0xff]  ;;  %v32_v16 = vld [vmem:[%s2869_s0 + $0x10] sm:$0xff] }
   0x5   :  { %v55_v12 = vld [vmem:[%s2869_s0 + $0xc8] sm:$0xff]  ;;  %v62_v13 = vpack.c.bf16 %v31_v10, %v30_v9  ;;  %v1859_v15 = vld [vmem:[%s2870_s3 + $0x40] sm:$0xff]   ;;  %v33_v17 = vld [vmem:[%s2869_s0 + $0x18] sm:$0xff]  ;;  %v88_v9 = vlaneseq }
   0x6   :  { %v74_v14 = vpack.c.bf16 %v55_v12, %v54_v11  ;;  %v56_v18 = vld [vmem:[%s2869_s0 + $0xd0] sm:$0xff]  ;;  %v1860_v19 = vld [vmem:[%s2870_s3] sm:$0xff]   ;;  %v1861_v20 = vld [vmem:[%s2870_s3 + $0x48] sm:$0xff]   ;;  %v63_v23 = vpack.c.bf16 %v33_v17, %v32_v16 }
   0x7   :  { %190 = vmatpush1.bf16.msra.mxu0 %v1852_v4  ;;  %1841 = vmatpush1.bf16.msra.mxu1 %v1852_v4  ;;  %v57_v21 = vld [vmem:[%s2869_s0 + $0xd8] sm:$0xff]  ;;  %v1862_v22 = vld [vmem:[%s2870_s3 + $0x8] sm:$0xff]   ;;  %v1863_v25 = vld [vmem:[%s2870_s3 + $0x50] sm:$0xff]   ;;  %v89_v10 = vshrl.u32 %v88_v9, 7 }
   0x8   :  { %191 = vmatprep.subr.bf16.mxu0 %v1853_v5  ;;  %1838 = vmatprep.subr.bf16.mxu1 %v1853_v5  ;;  %v75_v24 = vpack.c.bf16 %v57_v21, %v56_v18  ;;  %v34_v26 = vld [vmem:[%s2869_s0 + $0x20] sm:$0xff]  ;;  %v35_v27 = vld [vmem:[%s2869_s0 + $0x28] sm:$0xff]  ;;  %v1864_v29 = vld [vmem:[%s2870_s3 + $0x10] sm:$0xff]  }
   0x9   :  { %v58_v28 = vld [vmem:[%s2869_s0 + $0xe0] sm:$0xff]  ;;  %v1865_v30 = vld [vmem:[%s2870_s3 + $0x58] sm:$0xff]   ;;  %v59_v31 = vld [vmem:[%s2869_s0 + $0xe8] sm:$0xff]  ;;  %v64_v33 = vpack.c.bf16 %v35_v27, %v34_v26  ;;  %v90_v11 = vsub.s32 0, %v89_v10 }
   0xa   :  { %v1866_v32 = vld [vmem:[%s2870_s3 + $0x18] sm:$0xff]   ;;  %v76_v34 = vpack.c.bf16 %v59_v31, %v58_v28  ;;  %v1867_v35 = vld [vmem:[%s2870_s3 + $0x60] sm:$0xff]   ;;  %v36_v37 = vld [vmem:[%s2869_s0 + $0x30] sm:$0xff] }
   0xb   :  { %192 = vmatpush1.bf16.msra.mxu0 %v1855_v6  ;;  %1842 = vmatpush1.bf16.msra.mxu1 %v1855_v6  ;;  %v1868_v36 = vld [vmem:[%s2870_s3 + $0x20] sm:$0xff]   ;;  %v1869_v38 = vld [vmem:[%s2870_s3 + $0x68] sm:$0xff]   ;;  %v37_v39 = vld [vmem:[%s2869_s0 + $0x38] sm:$0xff] }
   0xc   :  { %193 = vmatprep.subr.bf16.mxu0 %v1856_v7  ;;  %1839 = vmatprep.subr.bf16.mxu1 %v1856_v7  ;;  %v60_v40 = vld [vmem:[%s2869_s0 + $0xf0] sm:$0xff]  ;;  %v61_v41 = vld [vmem:[%s2869_s0 + $0xf8] sm:$0xff]  ;;  %v1870_v42 = vld [vmem:[%s2870_s3 + $0x28] sm:$0xff]   ;;  %v65_v43 = vpack.c.bf16 %v37_v39, %v36_v37 }
   0xd   :  { %v77_v44 = vpack.c.bf16 %v61_v41, %v60_v40  ;;  %v38_v45 = vld [vmem:[%s2869_s0 + $0x40] sm:$0xff]  ;;  %v39_v46 = vld [vmem:[%s2869_s0 + $0x48] sm:$0xff]  ;;  %v40_v48 = vld [vmem:[%s2869_s0 + $0x50] sm:$0xff] }
   0xe   :  { %v66_v47 = vpack.c.bf16 %v39_v46, %v38_v45  ;;  %v41_v49 = vld [vmem:[%s2869_s0 + $0x58] sm:$0xff]  ;;  %v42_v51 = vld [vmem:[%s2869_s0 + $0x60] sm:$0xff]  ;;  %v43_v52 = vld [vmem:[%s2869_s0 + $0x68] sm:$0xff] }
   0xf   :  { %194 = vmatpush1.bf16.msra.mxu0 %v1858_v8  ;;  %1843 = vmatpush1.bf16.msra.mxu1 %v1858_v8  ;;  %v67_v50 = vpack.c.bf16 %v41_v49, %v40_v48  ;;  %v68_v53 = vpack.c.bf16 %v43_v52, %v42_v51  ;;  %v44_v54 = vld [vmem:[%s2869_s0 + $0x70] sm:$0xff]  ;;  %v45_v55 = vld [vmem:[%s2869_s0 + $0x78] sm:$0xff]  ;;  %v46_v57 = vld [vmem:[%s2869_s0 + $0x80] sm:$0xff] }
  0x10   :  { %1652 = vmatprep.subr.bf16.mxu1 %v1859_v15  ;;  %v69_v56 = vpack.c.bf16 %v45_v55, %v44_v54  ;;  %v47_v58 = vld [vmem:[%s2869_s0 + $0x88] sm:$0xff]  ;;  %v48_v60 = vld [vmem:[%s2869_s0 + $0x90] sm:$0xff]  ;;  %v49_v61 = vld [vmem:[%s2869_s0 + $0x98] sm:$0xff] }
  0x11   :  { %v70_v59 = vpack.c.bf16 %v47_v58, %v46_v57  ;;  %v71_v62 = vpack.c.bf16 %v49_v61, %v48_v60  ;;  %v50_v63 = vld [vmem:[%s2869_s0 + $0xa0] sm:$0xff]  ;;  %v51_v0 = vld [vmem:[%s2869_s0 + $0xa8] sm:$0xff]  ;;  %v52_v3 = vld [vmem:[%s2869_s0 + $0xb0] sm:$0xff] }
  0x12   :  { %1610 = vmatmul.mubr.msk.bf16.vlgmr.msra.gmra.mrb[0].mxu0 %vm138_vm0, %v62_v13  ;;  %1622 = vmatmul.mubr.msk.bf16.vlgmr.msra.gmra.mrb[0].mxu1 %vm138_vm0, %v74_v14  ;;  %v72_v2 = vpack.c.bf16 %v51_v0, %v50_v63  ;;  %v53_v4 = vld [vmem:[%s2869_s0 + $0xb8] sm:$0xff]  ;;  %v1871_v6 = vld [vmem:[%s2870_s3 + $0x70] sm:$0xff]   ;;  %v86_v12 = vld [vmem:[%s2871_s2] sm:$0x3]  ;;  %v94_v13 = vsub.s32 1, %v89_v10  ;;  %s1949_s2 = smov 32  }
  0x13   :  { %229 = vmatprep.mubr.bf16.mxu0 %v1947_v1  ;;  %349 = vmatprep.mubr.bf16.mxu1 %v1947_v1  ;;  %v73_v5 = vpack.c.bf16 %v53_v4, %v52_v3  ;;  %v1872_v7 = vld [vmem:[%s2870_s3 + $0x30] sm:$0xff]   ;;  %v1874_v8 = vld [vmem:[%s2870_s3 + $0x38] sm:$0xff]   ;;  %v2198_v14 = vrot.slane %v86_v12, %v90_v11  ;;  %v1876_v39 = vld [vmem:[%s2872_s5 + $0x8] sm:$0xff]  }
  0x14   :  { %1653 = vmatpush3.bf16.msra.mxu1 %v1860_v19  ;;  %v2200_v15 = vrot.slane %v86_v12, %v94_v13 }
  0x15   :  { %1654 = vmatprep.subr.bf16.mxu1 %v1861_v20 }
  0x18   :  { %1655 = vmatpush3.bf16.msra.mxu1 %v1862_v22 }
  0x19   :  { %1656 = vmatprep.subr.bf16.mxu1 %v1863_v25 }
  0x1a   :  { %1611 = vmatmul.mubr.msk.bf16.gmra.mrb[4].mxu0 %vm138_vm0, %v63_v23  ;;  %1623 = vmatmul.mubr.msk.bf16.gmra.mrb[4].mxu1 %vm138_vm0, %v75_v24 }
  0x1b   :  { %239 = vmatprep.mubr.bf16.mxu0 %v1947_v1  ;;  %359 = vmatprep.mubr.bf16.mxu1 %v1947_v1 }
  0x1c   :  { %1657 = vmatpush3.bf16.msra.mxu1 %v1864_v29 }
  0x1d   :  { %1658 = vmatprep.subr.bf16.mxu1 %v1865_v30 }
  0x20   :  { %1659 = vmatpush3.bf16.msra.mxu1 %v1866_v32 }
  0x21   :  { %1660 = vmatprep.subr.bf16.mxu1 %v1867_v35 }
  0x22   :  { %1612 = vmatmul.mubr.msk.bf16.gmra.mrb[8].mxu0 %vm138_vm0, %v64_v33  ;;  %1624 = vmatmul.mubr.msk.bf16.gmra.mrb[8].mxu1 %vm138_vm0, %v76_v34 }
  0x23   :  { %249 = vmatprep.mubr.bf16.mxu0 %v1947_v1  ;;  %369 = vmatprep.mubr.bf16.mxu1 %v1947_v1 }
  0x24   :  { %1661 = vmatpush3.bf16.msra.mxu1 %v1868_v36 }
  0x25   :  { %1662 = vmatprep.subr.bf16.mxu1 %v1869_v38  ;;  %v1875_v38 = vld [vmem:[%s2872_s5] sm:$0xff]  }
  0x26   :  { %1788 = vmatprep.subr.bf16.mxu0 %v1875_v38 }
  0x27   :  { %1789 = vmatpush3.bf16.msra.mxu0 %v1875_v38 }
  0x28   :  { %1663 = vmatpush3.bf16.msra.mxu1 %v1870_v42  ;;  %1790 = vmatprep.subr.bf16.mxu0 %v1876_v39 }
  0x29   :  { %1664 = vmatprep.subr.bf16.mxu1 %v1871_v6 }
  0x2a   :  { %1613 = vmatmul.mubr.msk.bf16.gmra.mrb[12].mxu0 %vm138_vm0, %v65_v43  ;;  %1625 = vmatmul.mubr.msk.bf16.gmra.mrb[12].mxu1 %vm138_vm0, %v77_v44  ;;  %v1877_v44 = vld [vmem:[%s2872_s5 + $0x10] sm:$0xff]  }
  0x2b   :  { %259 = vmatprep.mubr.bf16.mxu0 %v1947_v1  ;;  %1791 = vmatpush3.bf16.msra.mxu0 %v1876_v39 }
  0x2c   :  { %1665 = vmatpush3.bf16.msra.mxu1 %v1872_v7  ;;  %1792 = vmatprep.subr.bf16.mxu0 %v1877_v44 }
  0x2f   :  { %1793 = vmatpush3.bf16.msra.mxu0 %v1877_v44 }
  0x32   :  { %1614 = vmatmul.mubr.msk.bf16.gmra.mrb[16].mxu0 %vm138_vm0, %v66_v47 }
  0x33   :  { %269 = vmatprep.mubr.bf16.mxu0 %v1947_v1 }
  0x3a   :  { %1615 = vmatmul.mubr.msk.bf16.gmra.mrb[20].mxu0 %vm138_vm0, %v67_v50 }
  0x3b   :  { %279 = vmatprep.mubr.bf16.mxu0 %v1947_v1 }
  0x42   :  { %1616 = vmatmul.mubr.msk.bf16.gmra.mrb[24].mxu0 %vm138_vm0, %v68_v53 }
  0x43   :  { %289 = vmatprep.mubr.bf16.mxu0 %v1947_v1 }
  0x4a   :  { %1617 = vmatmul.mubr.msk.bf16.gmra.mrb[28].mxu0 %vm138_vm0, %v69_v56 }
  0x4b   :  { %299 = vmatprep.mubr.bf16.mxu0 %v1947_v1 }
  0x52   :  { %1618 = vmatmul.mubr.msk.bf16.gmra.mrb[32].mxu0 %vm138_vm0, %v70_v59 }
  0x53   :  { %309 = vmatprep.mubr.bf16.mxu0 %v1947_v1 }
  0x5a   :  { %1619 = vmatmul.mubr.msk.bf16.gmra.mrb[36].mxu0 %vm138_vm0, %v71_v62 }
  0x5b   :  { %319 = vmatprep.mubr.bf16.mxu0 %v1947_v1 }
  0x62   :  { %1620 = vmatmul.mubr.msk.bf16.gmra.mrb[40].mxu0 %vm138_vm0, %v72_v2 }
  0x63   :  { %329 = vmatprep.mubr.bf16.mxu0 %v1947_v1  ;;  %v1873_v1 = vld [vmem:[%s2870_s3 + $0x78] sm:$0xff]  }
  0x64   :  { %1666 = vmatprep.subr.bf16.mxu1 %v1873_v1 }
  0x65   :  { %1667 = vmatpush3.bf16.msra.mxu1 %v1874_v8 }
  0x6a   :  { %1621 = vmatmul.mubr.msk.bf16.gmra.mrb[44].mxu0 %vm138_vm0, %v73_v5 }
  0xe5   :  { %v221_v16 = vpop.f32.mrb[0].mxu0  ;;  %v341_v17 = vpop.f32.mrb[0].mxu1 }
  0xe6   :  { %v222_v18 = vadd.f32 %v221_v16, %v2198_v14  ;;  %v223_v19 = vpop.f32.mrb[1].mxu0  ;;  %v342_v20 = vadd.f32 %v341_v17, %v2198_v14  ;;  %v343_v21 = vpop.f32.mrb[1].mxu1 }
  0xe7   :  { %v224_v22 = vadd.f32 %v223_v19, %v2200_v15  ;;  %v225_v23 = vpop.f32.mrb[2].mxu0  ;;  %v344_v24 = vadd.f32 %v343_v21, %v2200_v15  ;;  %v345_v25 = vpop.f32.mrb[2].mxu1 }
  0xe8   :  { %v380_v26 = vmax.f32 %v222_v18, 0.0  ;;  %v226_v27 = vadd.f32 %v225_v23, %v2198_v14  ;;  %v227_v28 = vpop.f32.mrb[3].mxu0  ;;  %v428_v29 = vmax.f32 %v342_v20, 0.0  ;;  %v346_v30 = vadd.f32 %v345_v25, %v2198_v14  ;;  %v347_v31 = vpop.f32.mrb[3].mxu1 }
  0xe9   :  { %v381_v32 = vmax.f32 %v224_v22, 0.0  ;;  %v228_v33 = vadd.f32 %v227_v28, %v2200_v15  ;;  %v429_v34 = vmax.f32 %v344_v24, 0.0  ;;  %v348_v35 = vadd.f32 %v347_v31, %v2200_v15 }
  0xea   :  { %v382_v36 = vmax.f32 %v226_v27, 0.0  ;;  %v430_v37 = vmax.f32 %v346_v30, 0.0 }
  0xeb   :  { %v383_v40 = vmax.f32 %v228_v33, 0.0  ;;  %v431_v41 = vmax.f32 %v348_v35, 0.0 }
  0xec   :  { %v444_v42 = vpack.c.bf16 %v382_v36, %v380_v26  ;;  %v2216_v43 = vpack.c.bf16 %v430_v37, %v428_v29 }
  0xed   :  { %v445_v45 = vpack.c.bf16 %v383_v40, %v381_v32  ;;  %v231_v46 = vpop.f32.mrb[4].mxu0  ;;  %v2221_v47 = vpack.c.bf16 %v431_v41, %v429_v34  ;;  %v351_v48 = vpop.f32.mrb[4].mxu1 }
  0xee   :  { %v232_v49 = vadd.f32 %v231_v46, %v2198_v14  ;;  %v233_v50 = vpop.f32.mrb[5].mxu0  ;;  %v352_v51 = vadd.f32 %v351_v48, %v2198_v14  ;;  %v353_v52 = vpop.f32.mrb[5].mxu1 }
  0xef   :  { %v234_v53 = vadd.f32 %v233_v50, %v2200_v15  ;;  %v235_v54 = vpop.f32.mrb[6].mxu0  ;;  %643 = vmatprep.mubr.bf16.mxu1 %v445_v45  ;;  %v354_v55 = vadd.f32 %v353_v52, %v2200_v15  ;;  %v355_v56 = vpop.f32.mrb[6].mxu1 }
  0xf0   :  { %v236_v57 = vadd.f32 %v235_v54, %v2198_v14  ;;  %v237_v58 = vpop.f32.mrb[7].mxu0  ;;  %644 = vmatmul.mubr.bf16.vlgmr.msra.gmra.mrb[16].mxu1 %v444_v42  ;;  %v432_v59 = vmax.f32 %v352_v51, 0.0  ;;  %v356_v60 = vadd.f32 %v355_v56, %v2198_v14  ;;  %v357_v61 = vpop.f32.mrb[7].mxu1  ;;  %v384_v2 = vmax.f32 %v232_v49, 0.0 }
  0xf1   :  { %v238_v62 = vadd.f32 %v237_v58, %v2200_v15  ;;  %v433_v63 = vmax.f32 %v354_v55, 0.0  ;;  %v358_v0 = vadd.f32 %v357_v61, %v2200_v15  ;;  %v385_v5 = vmax.f32 %v234_v53, 0.0 }
  0xf2   :  { %v386_v3 = vmax.f32 %v236_v57, 0.0  ;;  %v434_v4 = vmax.f32 %v356_v60, 0.0 }
  0xf3   :  { %v387_v6 = vmax.f32 %v238_v62, 0.0  ;;  %v435_v7 = vmax.f32 %v358_v0, 0.0 }
  0xf4   :  { %v446_v1 = vpack.c.bf16 %v386_v3, %v384_v2  ;;  %v2231_v8 = vpack.c.bf16 %v434_v4, %v432_v59 }
  0xf5   :  { %v447_v9 = vpack.c.bf16 %v387_v6, %v385_v5  ;;  %v241_v10 = vpop.f32.mrb[8].mxu0  ;;  %v2233_v11 = vpack.c.bf16 %v435_v7, %v433_v63  ;;  %v361_v12 = vpop.f32.mrb[8].mxu1 }
  0xf6   :  { %v242_v13 = vadd.f32 %v241_v10, %v2198_v14  ;;  %v243_v16 = vpop.f32.mrb[9].mxu0  ;;  %v362_v17 = vadd.f32 %v361_v12, %v2198_v14  ;;  %v363_v18 = vpop.f32.mrb[9].mxu1 }
  0xf7   :  { %v244_v19 = vadd.f32 %v243_v16, %v2200_v15  ;;  %v245_v20 = vpop.f32.mrb[10].mxu0  ;;  %651 = vmatprep.mubr.bf16.mxu1 %v447_v9  ;;  %v364_v21 = vadd.f32 %v363_v18, %v2200_v15  ;;  %v365_v22 = vpop.f32.mrb[10].mxu1 }
  0xf8   :  { %v246_v23 = vadd.f32 %v245_v20, %v2198_v14  ;;  %v247_v24 = vpop.f32.mrb[11].mxu0  ;;  %652 = vmatmul.mubr.bf16.gmra.mrb[20].mxu1 %v446_v1  ;;  %v436_v25 = vmax.f32 %v362_v17, 0.0  ;;  %v366_v26 = vadd.f32 %v365_v22, %v2198_v14  ;;  %v367_v27 = vpop.f32.mrb[11].mxu1  ;;  %v388_v31 = vmax.f32 %v242_v13, 0.0 }
  0xf9   :  { %v248_v28 = vadd.f32 %v247_v24, %v2200_v15  ;;  %v437_v29 = vmax.f32 %v364_v21, 0.0  ;;  %v368_v30 = vadd.f32 %v367_v27, %v2200_v15  ;;  %v389_v34 = vmax.f32 %v244_v19, 0.0 }
  0xfa   :  { %v390_v32 = vmax.f32 %v246_v23, 0.0  ;;  %v438_v33 = vmax.f32 %v366_v26, 0.0 }
  0xfb   :  { %v391_v35 = vmax.f32 %v248_v28, 0.0  ;;  %v439_v36 = vmax.f32 %v368_v30, 0.0 }
  0xfc   :  { %v448_v37 = vpack.c.bf16 %v390_v32, %v388_v31  ;;  %v2243_v38 = vpack.c.bf16 %v438_v33, %v436_v25 }
  0xfd   :  { %v449_v39 = vpack.c.bf16 %v391_v35, %v389_v34  ;;  %v251_v40 = vpop.f32.mrb[12].mxu0  ;;  %v2245_v41 = vpack.c.bf16 %v439_v36, %v437_v29  ;;  %v371_v42 = vpop.f32.mrb[12].mxu1 }
  0xfe   :  { %v252_v44 = vadd.f32 %v251_v40, %v2198_v14  ;;  %v253_v45 = vpop.f32.mrb[13].mxu0  ;;  %v372_v46 = vadd.f32 %v371_v42, %v2198_v14  ;;  %v373_v48 = vpop.f32.mrb[13].mxu1 }
  0xff   :  { %v254_v49 = vadd.f32 %v253_v45, %v2200_v15  ;;  %v255_v50 = vpop.f32.mrb[14].mxu0  ;;  %659 = vmatprep.mubr.bf16.mxu1 %v449_v39  ;;  %v374_v51 = vadd.f32 %v373_v48, %v2200_v15  ;;  %v375_v52 = vpop.f32.mrb[14].mxu1 }
 0x100   :  { %v256_v53 = vadd.f32 %v255_v50, %v2198_v14  ;;  %v257_v54 = vpop.f32.mrb[15].mxu0  ;;  %660 = vmatmul.mubr.bf16.gmra.mrb[24].mxu1 %v448_v37  ;;  %v440_v55 = vmax.f32 %v372_v46, 0.0  ;;  %v376_v56 = vadd.f32 %v375_v52, %v2198_v14  ;;  %v377_v57 = vpop.f32.mrb[15].mxu1  ;;  %v392_v61 = vmax.f32 %v252_v44, 0.0 }
 0x101   :  { %v258_v58 = vadd.f32 %v257_v54, %v2200_v15  ;;  %v441_v59 = vmax.f32 %v374_v51, 0.0  ;;  %v378_v60 = vadd.f32 %v377_v57, %v2200_v15  ;;  %v393_v0 = vmax.f32 %v254_v49, 0.0 }
 0x102   :  { %v394_v62 = vmax.f32 %v256_v53, 0.0  ;;  %v442_v63 = vmax.f32 %v376_v56, 0.0 }
 0x103   :  { %v395_v2 = vmax.f32 %v258_v58, 0.0  ;;  %v443_v3 = vmax.f32 %v378_v60, 0.0 }
 0x104   :  { %v450_v4 = vpack.c.bf16 %v394_v62, %v392_v61  ;;  %v2255_v5 = vpack.c.bf16 %v442_v63, %v440_v55 }
 0x105   :  { %v451_v6 = vpack.c.bf16 %v395_v2, %v393_v0  ;;  %v261_v7 = vpop.f32.mrb[16].mxu0  ;;  %v2257_v1 = vpack.c.bf16 %v443_v3, %v441_v59 }
 0x106   :  { %v262_v9 = vadd.f32 %v261_v7, %v2198_v14  ;;  %v263_v10 = vpop.f32.mrb[17].mxu0 }
 0x107   :  { %v264_v12 = vadd.f32 %v263_v10, %v2200_v15  ;;  %v265_v13 = vpop.f32.mrb[18].mxu0  ;;  %667 = vmatprep.mubr.bf16.mxu1 %v451_v6 }
 0x108   :  { %v266_v16 = vadd.f32 %v265_v13, %v2198_v14  ;;  %v267_v17 = vpop.f32.mrb[19].mxu0  ;;  %668 = vmatmul.mubr.bf16.gmra.mrb[28].mxu1 %v450_v4  ;;  %v396_v19 = vmax.f32 %v262_v9, 0.0 }
 0x109   :  { %v268_v18 = vadd.f32 %v267_v17, %v2200_v15  ;;  %v397_v21 = vmax.f32 %v264_v12, 0.0 }
 0x10a   :  { %v398_v20 = vmax.f32 %v266_v16, 0.0 }
 0x10b   :  { %v399_v22 = vmax.f32 %v268_v18, 0.0 }
 0x10c   :  { %v452_v23 = vpack.c.bf16 %v398_v20, %v396_v19 }
 0x10d   :  { %v453_v24 = vpack.c.bf16 %v399_v22, %v397_v21  ;;  %v271_v25 = vpop.f32.mrb[20].mxu0 }
 0x10e   :  { %v272_v26 = vadd.f32 %v271_v25, %v2198_v14  ;;  %v273_v27 = vpop.f32.mrb[21].mxu0 }
 0x10f   :  { %v274_v28 = vadd.f32 %v273_v27, %v2200_v15  ;;  %v275_v29 = vpop.f32.mrb[22].mxu0  ;;  %675 = vmatprep.mubr.bf16.mxu1 %v453_v24 }
 0x110   :  { %v276_v30 = vadd.f32 %v275_v29, %v2198_v14  ;;  %v277_v31 = vpop.f32.mrb[23].mxu0  ;;  %676 = vmatmul.mubr.bf16.gmra.mrb[32].mxu1 %v452_v23  ;;  %v400_v33 = vmax.f32 %v272_v26, 0.0 }
 0x111   :  { %v278_v32 = vadd.f32 %v277_v31, %v2200_v15  ;;  %v401_v35 = vmax.f32 %v274_v28, 0.0 }
 0x112   :  { %v402_v34 = vmax.f32 %v276_v30, 0.0 }
 0x113   :  { %v403_v36 = vmax.f32 %v278_v32, 0.0 }
 0x114   :  { %v454_v37 = vpack.c.bf16 %v402_v34, %v400_v33 }
 0x115   :  { %v455_v39 = vpack.c.bf16 %v403_v36, %v401_v35  ;;  %v281_v40 = vpop.f32.mrb[24].mxu0 }
 0x116   :  { %v282_v42 = vadd.f32 %v281_v40, %v2198_v14  ;;  %v283_v44 = vpop.f32.mrb[25].mxu0 }
 0x117   :  { %v284_v45 = vadd.f32 %v283_v44, %v2200_v15  ;;  %v285_v46 = vpop.f32.mrb[26].mxu0  ;;  %683 = vmatprep.mubr.bf16.mxu1 %v455_v39 }
 0x118   :  { %v286_v48 = vadd.f32 %v285_v46, %v2198_v14  ;;  %v287_v49 = vpop.f32.mrb[27].mxu0  ;;  %684 = vmatmul.mubr.bf16.gmra.mrb[36].mxu1 %v454_v37  ;;  %v404_v51 = vmax.f32 %v282_v42, 0.0 }
 0x119   :  { %v288_v50 = vadd.f32 %v287_v49, %v2200_v15  ;;  %v405_v53 = vmax.f32 %v284_v45, 0.0 }
 0x11a   :  { %v406_v52 = vmax.f32 %v286_v48, 0.0 }
 0x11b   :  { %v407_v54 = vmax.f32 %v288_v50, 0.0 }
 0x11c   :  { %v456_v55 = vpack.c.bf16 %v406_v52, %v404_v51 }
 0x11d   :  { %v457_v56 = vpack.c.bf16 %v407_v54, %v405_v53  ;;  %v291_v57 = vpop.f32.mrb[28].mxu0 }
 0x11e   :  { %v292_v58 = vadd.f32 %v291_v57, %v2198_v14  ;;  %v293_v59 = vpop.f32.mrb[29].mxu0 }
 0x11f   :  { %v294_v60 = vadd.f32 %v293_v59, %v2200_v15  ;;  %v295_v61 = vpop.f32.mrb[30].mxu0  ;;  %691 = vmatprep.mubr.bf16.mxu1 %v457_v56 }
 0x120   :  { %v296_v62 = vadd.f32 %v295_v61, %v2198_v14  ;;  %v297_v63 = vpop.f32.mrb[31].mxu0  ;;  %692 = vmatmul.mubr.bf16.gmra.mrb[40].mxu1 %v456_v55  ;;  %v408_v2 = vmax.f32 %v292_v58, 0.0 }
 0x121   :  { %v298_v0 = vadd.f32 %v297_v63, %v2200_v15  ;;  %v409_v4 = vmax.f32 %v294_v60, 0.0 }
 0x122   :  { %v410_v3 = vmax.f32 %v296_v62, 0.0 }
 0x123   :  { %v411_v6 = vmax.f32 %v298_v0, 0.0 }
 0x124   :  { %v458_v7 = vpack.c.bf16 %v410_v3, %v408_v2 }
 0x125   :  { %v459_v9 = vpack.c.bf16 %v411_v6, %v409_v4  ;;  %v301_v10 = vpop.f32.mrb[32].mxu0  ;;  %v1878_v4 = vld [vmem:[%s2872_s5 + $0x18] sm:$0xff]  }
 0x126   :  { %v302_v12 = vadd.f32 %v301_v10, %v2198_v14  ;;  %v303_v13 = vpop.f32.mrb[33].mxu0  ;;  %1794 = vmatprep.subr.bf16.mxu0 %v1878_v4 }
 0x127   :  { %v304_v16 = vadd.f32 %v303_v13, %v2200_v15  ;;  %v305_v17 = vpop.f32.mrb[34].mxu0  ;;  %699 = vmatprep.mubr.bf16.mxu1 %v459_v9  ;;  %1795 = vmatpush3.bf16.msra.mxu0 %v1878_v4 }
 0x128   :  { %v306_v18 = vadd.f32 %v305_v17, %v2198_v14  ;;  %v307_v19 = vpop.f32.mrb[35].mxu0  ;;  %700 = vmatmul.mubr.bf16.gmra.mrb[44].mxu1 %v458_v7  ;;  %v412_v21 = vmax.f32 %v302_v12, 0.0 }
 0x129   :  { %v308_v20 = vadd.f32 %v307_v19, %v2200_v15  ;;  %v413_v23 = vmax.f32 %v304_v16, 0.0  ;;  %v1881_v16 = vld [vmem:[%s2872_s5 + $0x30] sm:$0xff]  }
 0x12a   :  { %v414_v22 = vmax.f32 %v306_v18, 0.0 }
 0x12b   :  { %v415_v24 = vmax.f32 %v308_v20, 0.0 }
 0x12c   :  { %v460_v25 = vpack.c.bf16 %v414_v22, %v412_v21 }
 0x12d   :  { %v461_v26 = vpack.c.bf16 %v415_v24, %v413_v23  ;;  %v311_v27 = vpop.f32.mrb[36].mxu0 }
 0x12e   :  { %v312_v28 = vadd.f32 %v311_v27, %v2198_v14  ;;  %v313_v29 = vpop.f32.mrb[37].mxu0 }
 0x12f   :  { %v314_v30 = vadd.f32 %v313_v29, %v2200_v15  ;;  %v315_v31 = vpop.f32.mrb[38].mxu0  ;;  %707 = vmatprep.mubr.bf16.mxu1 %v461_v26 }
 0x130   :  { %v316_v32 = vadd.f32 %v315_v31, %v2198_v14  ;;  %v317_v33 = vpop.f32.mrb[39].mxu0  ;;  %708 = vmatmul.mubr.bf16.gmra.mrb[48].mxu1 %v460_v25  ;;  %v416_v35 = vmax.f32 %v312_v28, 0.0 }
 0x131   :  { %v318_v34 = vadd.f32 %v317_v33, %v2200_v15  ;;  %v417_v37 = vmax.f32 %v314_v30, 0.0 }
 0x132   :  { %v418_v36 = vmax.f32 %v316_v32, 0.0 }
 0x133   :  { %v419_v39 = vmax.f32 %v318_v34, 0.0 }
 0x134   :  { %v462_v40 = vpack.c.bf16 %v418_v36, %v416_v35 }
 0x135   :  { %v463_v42 = vpack.c.bf16 %v419_v39, %v417_v37  ;;  %v321_v44 = vpop.f32.mrb[40].mxu0 }
 0x136   :  { %v322_v45 = vadd.f32 %v321_v44, %v2198_v14  ;;  %v323_v46 = vpop.f32.mrb[41].mxu0 }
 0x137   :  { %v324_v48 = vadd.f32 %v323_v46, %v2200_v15  ;;  %v325_v49 = vpop.f32.mrb[42].mxu0  ;;  %715 = vmatprep.mubr.bf16.mxu1 %v463_v42 }
 0x138   :  { %v326_v50 = vadd.f32 %v325_v49, %v2198_v14  ;;  %v327_v51 = vpop.f32.mrb[43].mxu0  ;;  %716 = vmatmul.mubr.bf16.gmra.mrb[52].mxu1 %v462_v40  ;;  %v420_v53 = vmax.f32 %v322_v45, 0.0 }
 0x139   :  { %v328_v52 = vadd.f32 %v327_v51, %v2200_v15  ;;  %v421_v55 = vmax.f32 %v324_v48, 0.0 }
 0x13a   :  { %v422_v54 = vmax.f32 %v326_v50, 0.0 }
 0x13b   :  { %v423_v56 = vmax.f32 %v328_v52, 0.0 }
 0x13c   :  { %v464_v57 = vpack.c.bf16 %v422_v54, %v420_v53 }
 0x13d   :  { %v465_v58 = vpack.c.bf16 %v423_v56, %v421_v55  ;;  %v331_v59 = vpop.f32.mrb[44].mxu0 }
 0x13e   :  { %v332_v60 = vadd.f32 %v331_v59, %v2198_v14  ;;  %v333_v61 = vpop.f32.mrb[45].mxu0 }
 0x13f   :  { %v334_v62 = vadd.f32 %v333_v61, %v2200_v15  ;;  %v335_v63 = vpop.f32.mrb[46].mxu0  ;;  %723 = vmatprep.mubr.bf16.mxu1 %v465_v58 }
 0x140   :  { %v336_v0 = vadd.f32 %v335_v63, %v2198_v14  ;;  %v337_v2 = vpop.f32.mrb[47].mxu0  ;;  %724 = vmatmul.mubr.bf16.gmra.mrb[56].mxu1 %v464_v57  ;;  %v424_v6 = vmax.f32 %v332_v60, 0.0  ;;  %v1879_v14 = vld [vmem:[%s2872_s5 + $0x20] sm:$0xff]  }
 0x141   :  { %v338_v3 = vadd.f32 %v337_v2, %v2200_v15  ;;  %v425_v9 = vmax.f32 %v334_v62, 0.0  ;;  %1796 = vmatprep.subr.bf16.mxu0 %v1879_v14  ;;  %v1880_v15 = vld [vmem:[%s2872_s5 + $0x28] sm:$0xff]  }
 0x142   :  { %v426_v7 = vmax.f32 %v336_v0, 0.0  ;;  %1797 = vmatpush3.bf16.msra.mxu0 %v1879_v14 }
 0x143   :  { %v427_v10 = vmax.f32 %v338_v3, 0.0  ;;  %1798 = vmatprep.subr.bf16.mxu0 %v1880_v15 }
 0x144   :  { %v466_v12 = vpack.c.bf16 %v426_v7, %v424_v6 }
 0x145   :  { %v467_v13 = vpack.c.bf16 %v427_v10, %v425_v9 }
 0x146   :  { %1799 = vmatpush3.bf16.msra.mxu0 %v1880_v15 }
 0x147   :  { %731 = vmatprep.mubr.bf16.mxu1 %v467_v13  ;;  %1800 = vmatprep.subr.bf16.mxu0 %v1881_v16 }
 0x148   :  { %732 = vmatmul.mubr.bf16.gmra.mrb[60].mxu1 %v466_v12 }
 0x149   :  { %739 = vmatprep.mubr.bf16.mxu1 %v2221_v47  ;;  %v1882_v47 = vld [vmem:[%s2872_s5 + $0x38] sm:$0xff]  }
 0x14a   :  { %1801 = vmatpush3.bf16.msra.mxu0 %v1881_v16 }
 0x14b   :  { %1802 = vmatprep.subr.bf16.mxu0 %v1882_v47 }
 0x14e   :  { %1803 = vmatpush3.bf16.msra.mxu0 %v1882_v47 }
 0x150   :  { %740 = vmatmul.mubr.bf16.gmra.mrb[64].mxu1 %v2216_v43 }
 0x151   :  { %747 = vmatprep.mubr.bf16.mxu1 %v2233_v11  ;;  %v2317_v11 = vld [vmem:[%s2873_s4] ss:$0 sm:$0xff] }
 0x158   :  { %748 = vmatmul.mubr.bf16.gmra.mrb[68].mxu1 %v2231_v8 }
 0x159   :  { %755 = vmatprep.mubr.bf16.mxu1 %v2245_v41 }
 0x160   :  { %756 = vmatmul.mubr.bf16.gmra.mrb[72].mxu1 %v2243_v38 }
 0x161   :  { %763 = vmatprep.mubr.bf16.mxu1 %v2257_v1 }
 0x168   :  { %764 = vmatmul.mubr.bf16.gmra.mrb[76].mxu1 %v2255_v5 }
 0x1c3   :  { %v1668_v43 = vpop.f32.mrb[16].mxu1 }
 0x1c4   :  { %v1669_v17 = vpop.f32.mrb[17].mxu1 }
 0x1c5   :  { %v1670_v18 = vadd.f32 %v1669_v17, %v1668_v43  ;;  %v1671_v19 = vpop.f32.mrb[18].mxu1 }
 0x1c6   :  { %v1672_v20 = vpop.f32.mrb[19].mxu1 }
 0x1c7   :  { %v646_v8 = vadd.f32 %v1670_v18, %v2317_v11  ;;  %v1673_v21 = vadd.f32 %v1672_v20, %v1671_v19 }
 0x1c9   :  { %v649_v41 = vadd.f32 %v1673_v21, %v2317_v11  ;;  %v772_v38 = vmax.f32 %v646_v8, 0.0 }
 0x1cb   :  { %v773_v22 = vmax.f32 %v649_v41, 0.0  ;;  %v1674_v1 = vpop.f32.mrb[20].mxu1 }
 0x1cc   :  { %v1675_v23 = vpop.f32.mrb[21].mxu1 }
 0x1cd   :  { %v1676_v5 = vadd.f32 %v1675_v23, %v1674_v1  ;;  %v1677_v24 = vpop.f32.mrb[22].mxu1  ;;  %v804_v25 = vpack.c.bf16 %v773_v22, %v772_v38 }
 0x1ce   :  { %v1678_v26 = vpop.f32.mrb[23].mxu1 }
 0x1cf   :  { %v654_v27 = vadd.f32 %v1676_v5, %v2317_v11  ;;  %v1679_v28 = vadd.f32 %v1678_v26, %v1677_v24  ;;  %1804 = vmatprep.mubr.bf16.mxu0 %v804_v25 }
 0x1d1   :  { %v657_v29 = vadd.f32 %v1679_v28, %v2317_v11  ;;  %v774_v30 = vmax.f32 %v654_v27, 0.0 }
 0x1d3   :  { %v775_v31 = vmax.f32 %v657_v29, 0.0  ;;  %v1680_v32 = vpop.f32.mrb[24].mxu1 }
 0x1d4   :  { %v1681_v33 = vpop.f32.mrb[25].mxu1 }
 0x1d5   :  { %v805_v34 = vpack.c.bf16 %v775_v31, %v774_v30  ;;  %v1682_v35 = vadd.f32 %v1681_v33, %v1680_v32  ;;  %v1683_v36 = vpop.f32.mrb[26].mxu1 }
 0x1d6   :  { %v1684_v37 = vpop.f32.mrb[27].mxu1 }
 0x1d7   :  { %v662_v39 = vadd.f32 %v1682_v35, %v2317_v11  ;;  %v1685_v40 = vadd.f32 %v1684_v37, %v1683_v36  ;;  %1805 = vmatmul.mubr.bf16.vlgmr.msra.gmra.mrb[48].mxu0 %v805_v34 }
 0x1d9   :  { %v665_v42 = vadd.f32 %v1685_v40, %v2317_v11  ;;  %v776_v44 = vmax.f32 %v662_v39, 0.0 }
 0x1db   :  { %v777_v45 = vmax.f32 %v665_v42, 0.0  ;;  %v1686_v46 = vpop.f32.mrb[28].mxu1 }
 0x1dc   :  { %v1687_v48 = vpop.f32.mrb[29].mxu1 }
 0x1dd   :  { %v1688_v49 = vadd.f32 %v1687_v48, %v1686_v46  ;;  %v1689_v50 = vpop.f32.mrb[30].mxu1  ;;  %v806_v51 = vpack.c.bf16 %v777_v45, %v776_v44 }
 0x1de   :  { %v1690_v52 = vpop.f32.mrb[31].mxu1 }
 0x1df   :  { %v670_v53 = vadd.f32 %v1688_v49, %v2317_v11  ;;  %v1691_v54 = vadd.f32 %v1690_v52, %v1689_v50  ;;  %1808 = vmatprep.mubr.bf16.mxu0 %v806_v51 }
 0x1e1   :  { %v673_v55 = vadd.f32 %v1691_v54, %v2317_v11  ;;  %v778_v56 = vmax.f32 %v670_v53, 0.0 }
 0x1e3   :  { %v779_v57 = vmax.f32 %v673_v55, 0.0  ;;  %v1692_v58 = vpop.f32.mrb[32].mxu1 }
 0x1e4   :  { %v1693_v59 = vpop.f32.mrb[33].mxu1 }
 0x1e5   :  { %v1694_v60 = vadd.f32 %v1693_v59, %v1692_v58  ;;  %v1695_v61 = vpop.f32.mrb[34].mxu1  ;;  %v807_v62 = vpack.c.bf16 %v779_v57, %v778_v56 }
 0x1e6   :  { %v1696_v63 = vpop.f32.mrb[35].mxu1 }
 0x1e7   :  { %v678_v0 = vadd.f32 %v1694_v60, %v2317_v11  ;;  %v1697_v2 = vadd.f32 %v1696_v63, %v1695_v61  ;;  %1809 = vmatmul.mubr.bf16.gmra.mrb[52].mxu0 %v807_v62 }
 0x1e9   :  { %v681_v3 = vadd.f32 %v1697_v2, %v2317_v11  ;;  %v780_v4 = vmax.f32 %v678_v0, 0.0 }
 0x1eb   :  { %v781_v6 = vmax.f32 %v681_v3, 0.0  ;;  %v1698_v7 = vpop.f32.mrb[36].mxu1 }
 0x1ec   :  { %v1699_v9 = vpop.f32.mrb[37].mxu1 }
 0x1ed   :  { %v1700_v10 = vadd.f32 %v1699_v9, %v1698_v7  ;;  %v1701_v12 = vpop.f32.mrb[38].mxu1  ;;  %v808_v13 = vpack.c.bf16 %v781_v6, %v780_v4 }
 0x1ee   :  { %v1702_v14 = vpop.f32.mrb[39].mxu1 }
 0x1ef   :  { %v686_v15 = vadd.f32 %v1700_v10, %v2317_v11  ;;  %v1703_v16 = vadd.f32 %v1702_v14, %v1701_v12  ;;  %1812 = vmatprep.mubr.bf16.mxu0 %v808_v13 }
 0x1f1   :  { %v689_v47 = vadd.f32 %v1703_v16, %v2317_v11  ;;  %v782_v43 = vmax.f32 %v686_v15, 0.0 }
 0x1f3   :  { %v783_v17 = vmax.f32 %v689_v47, 0.0  ;;  %v1704_v18 = vpop.f32.mrb[40].mxu1 }
 0x1f4   :  { %v1705_v19 = vpop.f32.mrb[41].mxu1 }
 0x1f5   :  { %v1706_v20 = vadd.f32 %v1705_v19, %v1704_v18  ;;  %v1707_v8 = vpop.f32.mrb[42].mxu1  ;;  %v809_v21 = vpack.c.bf16 %v783_v17, %v782_v43 }
 0x1f6   :  { %v1708_v41 = vpop.f32.mrb[43].mxu1 }
 0x1f7   :  { %v694_v38 = vadd.f32 %v1706_v20, %v2317_v11  ;;  %v1709_v22 = vadd.f32 %v1708_v41, %v1707_v8  ;;  %1813 = vmatmul.mubr.bf16.gmra.mrb[56].mxu0 %v809_v21 }
 0x1f9   :  { %v697_v1 = vadd.f32 %v1709_v22, %v2317_v11  ;;  %v784_v23 = vmax.f32 %v694_v38, 0.0 }
 0x1fb   :  { %v785_v5 = vmax.f32 %v697_v1, 0.0  ;;  %v1710_v24 = vpop.f32.mrb[44].mxu1 }
 0x1fc   :  { %v1711_v25 = vpop.f32.mrb[45].mxu1 }
 0x1fd   :  { %v1712_v26 = vadd.f32 %v1711_v25, %v1710_v24  ;;  %v1713_v27 = vpop.f32.mrb[46].mxu1  ;;  %v810_v28 = vpack.c.bf16 %v785_v5, %v784_v23 }
 0x1fe   :  { %v1714_v29 = vpop.f32.mrb[47].mxu1 }
 0x1ff   :  { %v702_v30 = vadd.f32 %v1712_v26, %v2317_v11  ;;  %v1715_v31 = vadd.f32 %v1714_v29, %v1713_v27  ;;  %1816 = vmatprep.mubr.bf16.mxu0 %v810_v28 }
 0x201   :  { %v705_v32 = vadd.f32 %v1715_v31, %v2317_v11  ;;  %v786_v33 = vmax.f32 %v702_v30, 0.0 }
 0x203   :  { %v787_v34 = vmax.f32 %v705_v32, 0.0  ;;  %v1716_v35 = vpop.f32.mrb[48].mxu1 }
 0x204   :  { %v1717_v36 = vpop.f32.mrb[49].mxu1 }
 0x205   :  { %v1718_v37 = vadd.f32 %v1717_v36, %v1716_v35  ;;  %v1719_v39 = vpop.f32.mrb[50].mxu1  ;;  %v811_v40 = vpack.c.bf16 %v787_v34, %v786_v33 }
 0x206   :  { %v1720_v42 = vpop.f32.mrb[51].mxu1 }
 0x207   :  { %v710_v44 = vadd.f32 %v1718_v37, %v2317_v11  ;;  %v1721_v45 = vadd.f32 %v1720_v42, %v1719_v39  ;;  %1817 = vmatmul.mubr.bf16.gmra.mrb[60].mxu0 %v811_v40 }
 0x209   :  { %v713_v46 = vadd.f32 %v1721_v45, %v2317_v11  ;;  %v788_v48 = vmax.f32 %v710_v44, 0.0 }
 0x20b   :  { %v789_v49 = vmax.f32 %v713_v46, 0.0  ;;  %v1722_v50 = vpop.f32.mrb[52].mxu1 }
 0x20c   :  { %v1723_v51 = vpop.f32.mrb[53].mxu1 }
 0x20d   :  { %v1724_v52 = vadd.f32 %v1723_v51, %v1722_v50  ;;  %v1725_v53 = vpop.f32.mrb[54].mxu1  ;;  %v812_v54 = vpack.c.bf16 %v789_v49, %v788_v48 }
 0x20e   :  { %v1726_v55 = vpop.f32.mrb[55].mxu1 }
 0x20f   :  { %v718_v56 = vadd.f32 %v1724_v52, %v2317_v11  ;;  %v1727_v57 = vadd.f32 %v1726_v55, %v1725_v53  ;;  %1820 = vmatprep.mubr.bf16.mxu0 %v812_v54 }
 0x211   :  { %v721_v58 = vadd.f32 %v1727_v57, %v2317_v11  ;;  %v790_v59 = vmax.f32 %v718_v56, 0.0 }
 0x213   :  { %v791_v60 = vmax.f32 %v721_v58, 0.0  ;;  %v1728_v61 = vpop.f32.mrb[56].mxu1 }
 0x214   :  { %v1729_v62 = vpop.f32.mrb[57].mxu1 }
 0x215   :  { %v1730_v63 = vadd.f32 %v1729_v62, %v1728_v61  ;;  %v1731_v0 = vpop.f32.mrb[58].mxu1  ;;  %v813_v2 = vpack.c.bf16 %v791_v60, %v790_v59 }
 0x216   :  { %v1732_v3 = vpop.f32.mrb[59].mxu1 }
 0x217   :  { %v726_v4 = vadd.f32 %v1730_v63, %v2317_v11  ;;  %v1733_v6 = vadd.f32 %v1732_v3, %v1731_v0  ;;  %1821 = vmatmul.mubr.bf16.gmra.mrb[64].mxu0 %v813_v2  ;;  %v2354_v2 = vld [vmem:[%s2874_s6] ss:$0 sm:$0xff]  ;;  %s1948_s6 = smov 112  }
 0x219   :  { %v729_v7 = vadd.f32 %v1733_v6, %v2317_v11  ;;  %v792_v9 = vmax.f32 %v726_v4, 0.0 }
 0x21b   :  { %v793_v10 = vmax.f32 %v729_v7, 0.0  ;;  %v1734_v12 = vpop.f32.mrb[60].mxu1 }
 0x21c   :  { %v1735_v13 = vpop.f32.mrb[61].mxu1 }
 0x21d   :  { %v1736_v14 = vadd.f32 %v1735_v13, %v1734_v12  ;;  %v1737_v15 = vpop.f32.mrb[62].mxu1  ;;  %v814_v16 = vpack.c.bf16 %v793_v10, %v792_v9 }
 0x21e   :  { %v1738_v47 = vpop.f32.mrb[63].mxu1 }
 0x21f   :  { %v734_v43 = vadd.f32 %v1736_v14, %v2317_v11  ;;  %v1739_v17 = vadd.f32 %v1738_v47, %v1737_v15  ;;  %1824 = vmatprep.mubr.bf16.mxu0 %v814_v16 }
 0x221   :  { %v737_v18 = vadd.f32 %v1739_v17, %v2317_v11  ;;  %v794_v19 = vmax.f32 %v734_v43, 0.0 }
 0x223   :  { %v795_v20 = vmax.f32 %v737_v18, 0.0  ;;  %v1740_v8 = vpop.f32.mrb[64].mxu1 }
 0x224   :  { %v1741_v21 = vpop.f32.mrb[65].mxu1 }
 0x225   :  { %v1742_v41 = vadd.f32 %v1741_v21, %v1740_v8  ;;  %v1743_v38 = vpop.f32.mrb[66].mxu1  ;;  %v815_v22 = vpack.c.bf16 %v795_v20, %v794_v19 }
 0x226   :  { %v1744_v1 = vpop.f32.mrb[67].mxu1 }
 0x227   :  { %v742_v23 = vadd.f32 %v1742_v41, %v2317_v11  ;;  %v1745_v5 = vadd.f32 %v1744_v1, %v1743_v38  ;;  %1825 = vmatmul.mubr.bf16.gmra.mrb[68].mxu0 %v815_v22 }
 0x229   :  { %v745_v24 = vadd.f32 %v1745_v5, %v2317_v11  ;;  %v796_v25 = vmax.f32 %v742_v23, 0.0 }
 0x22b   :  { %v797_v26 = vmax.f32 %v745_v24, 0.0  ;;  %v1746_v27 = vpop.f32.mrb[68].mxu1 }
 0x22c   :  { %v1747_v28 = vpop.f32.mrb[69].mxu1 }
 0x22d   :  { %v1748_v29 = vadd.f32 %v1747_v28, %v1746_v27  ;;  %v1749_v30 = vpop.f32.mrb[70].mxu1  ;;  %v816_v31 = vpack.c.bf16 %v797_v26, %v796_v25 }
 0x22e   :  { %v1750_v32 = vpop.f32.mrb[71].mxu1 }
 0x22f   :  { %v750_v33 = vadd.f32 %v1748_v29, %v2317_v11  ;;  %v1751_v34 = vadd.f32 %v1750_v32, %v1749_v30  ;;  %1828 = vmatprep.mubr.bf16.mxu0 %v816_v31 }
 0x231   :  { %v753_v35 = vadd.f32 %v1751_v34, %v2317_v11  ;;  %v798_v36 = vmax.f32 %v750_v33, 0.0 }
 0x233   :  { %v799_v37 = vmax.f32 %v753_v35, 0.0  ;;  %v1752_v39 = vpop.f32.mrb[72].mxu1 }
 0x234   :  { %v1753_v40 = vpop.f32.mrb[73].mxu1 }
 0x235   :  { %v1754_v42 = vadd.f32 %v1753_v40, %v1752_v39  ;;  %v1755_v44 = vpop.f32.mrb[74].mxu1  ;;  %v817_v45 = vpack.c.bf16 %v799_v37, %v798_v36 }
 0x236   :  { %v1756_v46 = vpop.f32.mrb[75].mxu1 }
 0x237   :  { %v758_v48 = vadd.f32 %v1754_v42, %v2317_v11  ;;  %v1757_v49 = vadd.f32 %v1756_v46, %v1755_v44  ;;  %1829 = vmatmul.mubr.bf16.gmra.mrb[72].mxu0 %v817_v45 }
 0x239   :  { %v761_v50 = vadd.f32 %v1757_v49, %v2317_v11  ;;  %v800_v51 = vmax.f32 %v758_v48, 0.0 }
 0x23b   :  { %v801_v52 = vmax.f32 %v761_v50, 0.0  ;;  %v1758_v53 = vpop.f32.mrb[76].mxu1 }
 0x23c   :  { %v1759_v54 = vpop.f32.mrb[77].mxu1 }
 0x23d   :  { %v1760_v55 = vadd.f32 %v1759_v54, %v1758_v53  ;;  %v1761_v56 = vpop.f32.mrb[78].mxu1  ;;  %v818_v57 = vpack.c.bf16 %v801_v52, %v800_v51 }
 0x23e   :  { %v1762_v58 = vpop.f32.mrb[79].mxu1 }
 0x23f   :  { %v766_v59 = vadd.f32 %v1760_v55, %v2317_v11  ;;  %v1763_v60 = vadd.f32 %v1762_v58, %v1761_v56  ;;  %1832 = vmatprep.mubr.bf16.mxu0 %v818_v57 }
 0x241   :  { %v769_v61 = vadd.f32 %v1763_v60, %v2317_v11  ;;  %v802_v62 = vmax.f32 %v766_v59, 0.0 }
 0x243   :  { %v803_v63 = vmax.f32 %v769_v61, 0.0 }
 0x245   :  { %v819_v0 = vpack.c.bf16 %v803_v63, %v802_v62 }
 0x247   :  { %1833 = vmatmul.mubr.bf16.gmra.mrb[76].mxu0 %v819_v0 }
 0x2aa   :  { %v1806_v3 = vpop.f32.mrb[48].mxu0 }
 0x2ab   :  { %v2357_v4 = vadd.f32 %v1806_v3, %v2354_v2  ;;  %v925_v6 = vpop.f32.mrb[49].mxu0 }
 0x2ac   :  { %v2360_v7 = vadd.f32 %v2354_v2, %v925_v6  ;;  %v1807_v9 = vpop.f32.mrb[50].mxu0 }
 0x2ad   :  { %v1054_v11 = vmul.f32 0.5, %v2357_v4  ;;  %v2364_v10 = vadd.f32 %v1807_v9, %v2354_v2  ;;  %v928_v12 = vpop.f32.mrb[51].mxu0 }
 0x2ae   :  { %v1052_v13 = vmul.f32 0.5, %v2360_v7  ;;  %v2368_v14 = vadd.f32 %v2354_v2, %v928_v12 }
 0x2af   :  { %v1088_v15 = vmul.f32 1.442695, %v1054_v11  ;;  %v1055_v16 = vmul.f32 0.5, %v2364_v10 }
 0x2b0   :  { %v1084_v47 = vmul.f32 1.442695, %v1052_v13  ;;  %v1053_v43 = vmul.f32 0.5, %v2368_v14 }
 0x2b1   :  { %1883 = vpow2.f32 %v1088_v15  ;;  %v1090_v17 = vmul.f32 1.442695, %v1055_v16 }
 0x2b2   :  { %1885 = vpow2.f32 %v1084_v47  ;;  %v1086_v18 = vmul.f32 1.442695, %v1053_v43 }
 0x2b3   :  { %1887 = vpow2.f32 %v1090_v17 }
 0x2b4   :  { %1889 = vpow2.f32 %v1086_v18 }
 0x2ba   :  { %v1810_v19 = vpop.f32.mrb[52].mxu0 }
 0x2bb   :  { %v1884_v20 = vpop.eup %1883  ;;  %v2373_v8 = vadd.f32 %v1810_v19, %v2354_v2  ;;  %v941_v21 = vpop.f32.mrb[53].mxu0 }
 0x2bc   :  { %v1886_v41 = vpop.eup %1885  ;;  %v2376_v38 = vadd.f32 %v2354_v2, %v941_v21  ;;  %1216 = vrot.lane.b32.xlu1 %v1884_v20, %s1948_s6  ;;  %v1811_v22 = vpop.f32.mrb[54].mxu0 }
 0x2bd   :  { %v1058_v1 = vmul.f32 0.5, %v2373_v8  ;;  %v2381_v23 = vadd.f32 %v1811_v22, %v2354_v2  ;;  %v944_v5 = vpop.f32.mrb[55].mxu0  ;;  %1212 = vrot.lane.b32.xlu0 %v1886_v41, %s1948_s6  ;;  %v1888_v26 = vpop.eup %1887 }
 0x2be   :  { %v1056_v24 = vmul.f32 0.5, %v2376_v38  ;;  %v2386_v25 = vadd.f32 %v2354_v2, %v944_v5  ;;  %v1890_v29 = vpop.eup %1889 }
 0x2bf   :  { %v1096_v27 = vmul.f32 1.442695, %v1058_v1  ;;  %v1059_v28 = vmul.f32 0.5, %v2381_v23 }
 0x2c0   :  { %v1057_v30 = vmul.f32 0.5, %v2386_v25  ;;  %1218 = vrot.lane.b32.xlu1 %v1888_v26, %s1948_s6  ;;  %v1092_v31 = vmul.f32 1.442695, %v1056_v24 }
 0x2c1   :  { %1891 = vpow2.f32 %v1096_v27  ;;  %v1098_v32 = vmul.f32 1.442695, %v1059_v28  ;;  %1214 = vrot.lane.b32.xlu0 %v1890_v29, %s1948_s6 }
 0x2c2   :  { %v1094_v33 = vmul.f32 1.442695, %v1057_v30 }
 0x2c3   :  { %1893 = vpow2.f32 %v1098_v32 }
 0x2c4   :  { %1895 = vpow2.f32 %v1092_v31 }
 0x2c5   :  { %1897 = vpow2.f32 %v1094_v33 }
 0x2ca   :  { %v1814_v34 = vpop.f32.mrb[56].mxu0 }
 0x2cb   :  { %v1892_v35 = vpop.eup %1891  ;;  %v2393_v36 = vadd.f32 %v1814_v34, %v2354_v2  ;;  %v957_v37 = vpop.f32.mrb[57].mxu0 }
 0x2cc   :  { %v2396_v39 = vadd.f32 %v2354_v2, %v957_v37  ;;  %v1815_v40 = vpop.f32.mrb[58].mxu0  ;;  %1224 = vrot.lane.b32.xlu0 %v1892_v35, %s1948_s6 }
 0x2cd   :  { %v1894_v42 = vpop.eup %1893  ;;  %v1062_v44 = vmul.f32 0.5, %v2393_v36  ;;  %v2401_v45 = vadd.f32 %v1815_v40, %v2354_v2  ;;  %v960_v46 = vpop.f32.mrb[59].mxu0 }
 0x2ce   :  { %v1060_v48 = vmul.f32 0.5, %v2396_v39  ;;  %v2405_v49 = vadd.f32 %v2354_v2, %v960_v46  ;;  %1226 = vrot.lane.b32.xlu1 %v1894_v42, %s1948_s6  ;;  %v1896_v50 = vpop.eup %1895 }
 0x2cf   :  { %v1104_v51 = vmul.f32 1.442695, %v1062_v44  ;;  %v1063_v52 = vmul.f32 0.5, %v2401_v45  ;;  %v1898_v54 = vpop.eup %1897 }
 0x2d0   :  { %v1061_v53 = vmul.f32 0.5, %v2405_v49  ;;  %1220 = vrot.lane.b32.xlu0 %v1896_v50, %s1948_s6  ;;  %v1100_v55 = vmul.f32 1.442695, %v1060_v48 }
 0x2d1   :  { %1899 = vpow2.f32 %v1104_v51  ;;  %v1106_v56 = vmul.f32 1.442695, %v1063_v52 }
 0x2d2   :  { %1222 = vrot.lane.b32.xlu1 %v1898_v54, %s1948_s6  ;;  %v1102_v57 = vmul.f32 1.442695, %v1061_v53 }
 0x2d3   :  { %1901 = vpow2.f32 %v1106_v56 }
 0x2d4   :  { %1903 = vpow2.f32 %v1100_v55 }
 0x2d5   :  { %1905 = vpow2.f32 %v1102_v57 }
 0x2da   :  { %v1818_v58 = vpop.f32.mrb[60].mxu0 }
 0x2db   :  { %v1900_v59 = vpop.eup %1899  ;;  %v2413_v60 = vadd.f32 %v1818_v58, %v2354_v2  ;;  %v973_v61 = vpop.f32.mrb[61].mxu0 }
 0x2dc   :  { %v2416_v62 = vadd.f32 %v2354_v2, %v973_v61  ;;  %v1819_v63 = vpop.f32.mrb[62].mxu0  ;;  %1232 = vrot.lane.b32.xlu0 %v1900_v59, %s1948_s6 }
 0x2dd   :  { %v1902_v0 = vpop.eup %1901  ;;  %v1066_v3 = vmul.f32 0.5, %v2413_v60  ;;  %v2421_v6 = vadd.f32 %v1819_v63, %v2354_v2  ;;  %v976_v9 = vpop.f32.mrb[63].mxu0 }
 0x2de   :  { %v1064_v11 = vmul.f32 0.5, %v2416_v62  ;;  %v2425_v12 = vadd.f32 %v2354_v2, %v976_v9  ;;  %1234 = vrot.lane.b32.xlu1 %v1902_v0, %s1948_s6  ;;  %v1904_v13 = vpop.eup %1903 }
 0x2df   :  { %v1112_v15 = vmul.f32 1.442695, %v1066_v3  ;;  %v1067_v16 = vmul.f32 0.5, %v2421_v6  ;;  %v1906_v43 = vpop.eup %1905 }
 0x2e0   :  { %v1065_v47 = vmul.f32 0.5, %v2425_v12  ;;  %1228 = vrot.lane.b32.xlu0 %v1904_v13, %s1948_s6  ;;  %v1108_v17 = vmul.f32 1.442695, %v1064_v11 }
 0x2e1   :  { %1907 = vpow2.f32 %v1112_v15  ;;  %v1114_v18 = vmul.f32 1.442695, %v1067_v16 }
 0x2e2   :  { %1230 = vrot.lane.b32.xlu1 %v1906_v43, %s1948_s6  ;;  %v1110_v19 = vmul.f32 1.442695, %v1065_v47 }
 0x2e3   :  { %1909 = vpow2.f32 %v1114_v18 }
 0x2e4   :  { %1911 = vpow2.f32 %v1108_v17 }
 0x2e5   :  { %1913 = vpow2.f32 %v1110_v19 }
 0x2ea   :  { %v1822_v20 = vpop.f32.mrb[64].mxu0 }
 0x2eb   :  { %v1908_v21 = vpop.eup %1907  ;;  %v2433_v41 = vadd.f32 %v1822_v20, %v2354_v2  ;;  %v989_v22 = vpop.f32.mrb[65].mxu0 }
 0x2ec   :  { %v2436_v1 = vadd.f32 %v2354_v2, %v989_v22  ;;  %v1823_v5 = vpop.f32.mrb[66].mxu0  ;;  %1240 = vrot.lane.b32.xlu0 %v1908_v21, %s1948_s6 }
 0x2ed   :  { %v1910_v24 = vpop.eup %1909  ;;  %v1070_v26 = vmul.f32 0.5, %v2433_v41  ;;  %v2441_v27 = vadd.f32 %v1823_v5, %v2354_v2  ;;  %v992_v28 = vpop.f32.mrb[67].mxu0 }
 0x2ee   :  { %v1068_v29 = vmul.f32 0.5, %v2436_v1  ;;  %v2445_v30 = vadd.f32 %v2354_v2, %v992_v28  ;;  %1242 = vrot.lane.b32.xlu1 %v1910_v24, %s1948_s6  ;;  %v1912_v31 = vpop.eup %1911 }
 0x2ef   :  { %v1120_v32 = vmul.f32 1.442695, %v1070_v26  ;;  %v1071_v33 = vmul.f32 0.5, %v2441_v27  ;;  %v1914_v35 = vpop.eup %1913 }
 0x2f0   :  { %v1069_v34 = vmul.f32 0.5, %v2445_v30  ;;  %1236 = vrot.lane.b32.xlu0 %v1912_v31, %s1948_s6  ;;  %v1116_v37 = vmul.f32 1.442695, %v1068_v29 }
 0x2f1   :  { %1915 = vpow2.f32 %v1120_v32  ;;  %v1122_v40 = vmul.f32 1.442695, %v1071_v33 }
 0x2f2   :  { %1238 = vrot.lane.b32.xlu1 %v1914_v35, %s1948_s6  ;;  %v1118_v42 = vmul.f32 1.442695, %v1069_v34 }
 0x2f3   :  { %1917 = vpow2.f32 %v1122_v40 }
 0x2f4   :  { %1919 = vpow2.f32 %v1116_v37 }
 0x2f5   :  { %1921 = vpow2.f32 %v1118_v42 }
 0x2fa   :  { %v1826_v44 = vpop.f32.mrb[68].mxu0 }
 0x2fb   :  { %v1916_v46 = vpop.eup %1915  ;;  %v2453_v48 = vadd.f32 %v1826_v44, %v2354_v2  ;;  %v1005_v50 = vpop.f32.mrb[69].mxu0 }
 0x2fc   :  { %v2456_v51 = vadd.f32 %v2354_v2, %v1005_v50  ;;  %v1827_v52 = vpop.f32.mrb[70].mxu0  ;;  %1248 = vrot.lane.b32.xlu0 %v1916_v46, %s1948_s6 }
 0x2fd   :  { %v1918_v53 = vpop.eup %1917  ;;  %v1074_v54 = vmul.f32 0.5, %v2453_v48  ;;  %v2461_v55 = vadd.f32 %v1827_v52, %v2354_v2  ;;  %v1008_v56 = vpop.f32.mrb[71].mxu0 }
 0x2fe   :  { %v1072_v57 = vmul.f32 0.5, %v2456_v51  ;;  %v2465_v58 = vadd.f32 %v2354_v2, %v1008_v56  ;;  %1250 = vrot.lane.b32.xlu1 %v1918_v53, %s1948_s6  ;;  %v1920_v59 = vpop.eup %1919 }
 0x2ff   :  { %v1128_v61 = vmul.f32 1.442695, %v1074_v54  ;;  %v1075_v63 = vmul.f32 0.5, %v2461_v55  ;;  %v1922_v3 = vpop.eup %1921 }
 0x300   :  { %v1073_v0 = vmul.f32 0.5, %v2465_v58  ;;  %1244 = vrot.lane.b32.xlu0 %v1920_v59, %s1948_s6  ;;  %v1124_v9 = vmul.f32 1.442695, %v1072_v57 }
 0x301   :  { %1923 = vpow2.f32 %v1128_v61  ;;  %v1130_v11 = vmul.f32 1.442695, %v1075_v63 }
 0x302   :  { %1246 = vrot.lane.b32.xlu1 %v1922_v3, %s1948_s6  ;;  %v1126_v13 = vmul.f32 1.442695, %v1073_v0 }
 0x303   :  { %1925 = vpow2.f32 %v1130_v11 }
 0x304   :  { %1927 = vpow2.f32 %v1124_v9 }
 0x305   :  { %1929 = vpow2.f32 %v1126_v13 }
 0x30a   :  { %v1830_v15 = vpop.f32.mrb[72].mxu0 }
 0x30b   :  { %v1924_v16 = vpop.eup %1923  ;;  %v2473_v47 = vadd.f32 %v1830_v15, %v2354_v2  ;;  %v1021_v43 = vpop.f32.mrb[73].mxu0 }
 0x30c   :  { %v2476_v17 = vadd.f32 %v2354_v2, %v1021_v43  ;;  %v1831_v18 = vpop.f32.mrb[74].mxu0  ;;  %1256 = vrot.lane.b32.xlu0 %v1924_v16, %s1948_s6  ;;  %v1150_v16 = vld [vmem:[%s2875_s7 + $0x10] sm:$0xff] }
 0x30d   :  { %v1926_v19 = vpop.eup %1925  ;;  %v1078_v20 = vmul.f32 0.5, %v2473_v47  ;;  %v2481_v21 = vadd.f32 %v1831_v18, %v2354_v2  ;;  %v1024_v22 = vpop.f32.mrb[75].mxu0 }
 0x30e   :  { %v1076_v5 = vmul.f32 0.5, %v2476_v17  ;;  %v2485_v24 = vadd.f32 %v2354_v2, %v1024_v22  ;;  %1258 = vrot.lane.b32.xlu1 %v1926_v19, %s1948_s6  ;;  %v1928_v26 = vpop.eup %1927  ;;  %v1148_v22 = vld [vmem:[%s2875_s7] sm:$0xff] }
 0x30f   :  { %v1136_v28 = vmul.f32 1.442695, %v1078_v20  ;;  %v1079_v29 = vmul.f32 0.5, %v2481_v21  ;;  %v1930_v32 = vpop.eup %1929 }
 0x310   :  { %v1077_v31 = vmul.f32 0.5, %v2485_v24  ;;  %1252 = vrot.lane.b32.xlu0 %v1928_v26, %s1948_s6  ;;  %v1132_v33 = vmul.f32 1.442695, %v1076_v5  ;;  %v1151_v26 = vld [vmem:[%s2875_s7 + $0x18] sm:$0xff] }
 0x311   :  { %1931 = vpow2.f32 %v1136_v28  ;;  %v1138_v34 = vmul.f32 1.442695, %v1079_v29 }
 0x312   :  { %1254 = vrot.lane.b32.xlu1 %v1930_v32, %s1948_s6  ;;  %v1134_v35 = vmul.f32 1.442695, %v1077_v31 }
 0x313   :  { %1933 = vpow2.f32 %v1138_v34 }
 0x314   :  { %1935 = vpow2.f32 %v1132_v33  ;;  %v1149_v33 = vld [vmem:[%s2875_s7 + $0x8] sm:$0xff] }
 0x315   :  { %1937 = vpow2.f32 %v1134_v35 }
 0x31a   :  { %v1834_v37 = vpop.f32.mrb[76].mxu0 }
 0x31b   :  { %v1932_v40 = vpop.eup %1931  ;;  %v2493_v42 = vadd.f32 %v1834_v37, %v2354_v2  ;;  %v1037_v44 = vpop.f32.mrb[77].mxu0 }
 0x31c   :  { %v2496_v46 = vadd.f32 %v2354_v2, %v1037_v44  ;;  %v1835_v50 = vpop.f32.mrb[78].mxu0  ;;  %1264 = vrot.lane.b32.xlu0 %v1932_v40, %s1948_s6 }
 0x31d   :  { %v1934_v52 = vpop.eup %1933  ;;  %v1082_v53 = vmul.f32 0.5, %v2493_v42  ;;  %v2501_v54 = vadd.f32 %v1835_v50, %v2354_v2  ;;  %v1040_v56 = vpop.f32.mrb[79].mxu0 }
 0x31e   :  { %v1080_v57 = vmul.f32 0.5, %v2496_v46  ;;  %v2505_v59 = vadd.f32 %v2354_v2, %v1040_v56  ;;  %1266 = vrot.lane.b32.xlu1 %v1934_v52, %s1948_s6  ;;  %v1936_v61 = vpop.eup %1935  ;;  %v1154_v52 = vld [vmem:[%s2875_s7 + $0x30] sm:$0xff]  ;;  %v1155_v56 = vld [vmem:[%s2875_s7 + $0x38] sm:$0xff] }
 0x31f   :  { %v1144_v63 = vmul.f32 1.442695, %v1082_v53  ;;  %v1083_v0 = vmul.f32 0.5, %v2501_v54  ;;  %v1938_v9 = vpop.eup %1937 }
 0x320   :  { %v1081_v3 = vmul.f32 0.5, %v2505_v59  ;;  %1260 = vrot.lane.b32.xlu0 %v1936_v61, %s1948_s6  ;;  %v1140_v11 = vmul.f32 1.442695, %v1080_v57 }
 0x321   :  { %1939 = vpow2.f32 %v1144_v63  ;;  %v1146_v13 = vmul.f32 1.442695, %v1083_v0  ;;  %v1152_v63 = vld [vmem:[%s2875_s7 + $0x20] sm:$0xff] }
 0x322   :  { %1262 = vrot.lane.b32.xlu1 %v1938_v9, %s1948_s6  ;;  %v1142_v15 = vmul.f32 1.442695, %v1081_v3 }
 0x323   :  { %1941 = vpow2.f32 %v1146_v13 }
 0x324   :  { %1943 = vpow2.f32 %v1140_v11  ;;  %v1153_v11 = vld [vmem:[%s2875_s7 + $0x28] sm:$0xff] }
 0x325   :  { %1945 = vpow2.f32 %v1142_v15 }
 0x32b   :  { %v1940_v2 = vpop.eup %1939 }
 0x32c   :  { %1272 = vrot.lane.b32.xlu0 %v1940_v2, %s1948_s6 }
 0x32d   :  { %v1942_v43 = vpop.eup %1941 }
 0x32e   :  { %v1217_v18 = vpop.permute.xlu1 %1216  ;;  %1274 = vrot.lane.b32.xlu1 %v1942_v43, %s1948_s6  ;;  %v1944_v19 = vpop.eup %1943 }
 0x32f   :  { %v1310_v20 = vmul.f32 %v1217_v18, %v1150_v16  ;;  %v1213_v5 = vpop.permute.xlu0 %1212  ;;  %v1946_v28 = vpop.eup %1945 }
 0x330   :  { %1268 = vrot.lane.b32.xlu0 %v1944_v19, %s1948_s6  ;;  %v1308_v31 = vmul.f32 %v1213_v5, %v1148_v22  ;;  %v1158_v19 = vld [vmem:[%s2875_s7 + $0x50] sm:$0xff]  ;;  %v1159_v22 = vld [vmem:[%s2875_s7 + $0x58] sm:$0xff] }
 0x331   :  { %v1342_v29 = vadd.f32 %v1310_v20, %v2357_v4 }
 0x332   :  { %v1219_v32 = vpop.permute.xlu1 %1218  ;;  %1270 = vrot.lane.b32.xlu1 %v1946_v28, %s1948_s6  ;;  %v1340_v44 = vadd.f32 %v1308_v31, %v2360_v7  ;;  %v1156_v28 = vld [vmem:[%s2875_s7 + $0x40] sm:$0xff] }
 0x333   :  { %v1311_v34 = vmul.f32 %v1219_v32, %v1151_v26  ;;  %v1215_v35 = vpop.permute.xlu0 %1214 }
 0x334   :  { %1408 = vrot.lane.b32.xlu0 %v1342_v29, %s1949_s2  ;;  %v1309_v40 = vmul.f32 %v1215_v35, %v1149_v33  ;;  %v1157_v33 = vld [vmem:[%s2875_s7 + $0x48] sm:$0xff] }
 0x335   :  { %v1343_v37 = vadd.f32 %v1311_v34, %v2364_v10 }
 0x336   :  { %v1341_v50 = vadd.f32 %v1309_v40, %v2368_v14 }
 0x337   :  { %1410 = vrot.lane.b32.xlu1 %v1343_v37, %s1949_s2 }
 0x338   :  { %1404 = vrot.lane.b32.xlu0 %v1340_v44, %s1949_s2 }
 0x33b   :  { %1406 = vrot.lane.b32.xlu1 %v1341_v50, %s1949_s2 }
 0x33e   :  { %v1225_v53 = vpop.permute.xlu0 %1224 }
 0x33f   :  { %v1314_v57 = vmul.f32 %v1225_v53, %v1154_v52  ;;  %v1162_v52 = vld [vmem:[%s2875_s7 + $0x70] sm:$0xff] }
 0x340   :  { %v1227_v61 = vpop.permute.xlu1 %1226 }
 0x341   :  { %v1346_v0 = vadd.f32 %v1314_v57, %v2373_v8  ;;  %v1315_v3 = vmul.f32 %v1227_v61, %v1155_v56  ;;  %v1163_v56 = vld [vmem:[%s2875_s7 + $0x78] sm:$0xff] }
 0x342   :  { %v1221_v9 = vpop.permute.xlu0 %1220 }
 0x343   :  { %v1347_v13 = vadd.f32 %v1315_v3, %v2381_v23  ;;  %v1312_v15 = vmul.f32 %v1221_v9, %v1152_v63  ;;  %1416 = vrot.lane.b32.xlu0 %v1346_v0, %s1949_s2  ;;  %v1160_v63 = vld [vmem:[%s2875_s7 + $0x60] sm:$0xff] }
 0x344   :  { %v1223_v2 = vpop.permute.xlu1 %1222 }
 0x345   :  { %v1344_v16 = vadd.f32 %v1312_v15, %v2376_v38  ;;  %v1313_v43 = vmul.f32 %v1223_v2, %v1153_v11  ;;  %1418 = vrot.lane.b32.xlu1 %v1347_v13, %s1949_s2  ;;  %v1161_v11 = vld [vmem:[%s2875_s7 + $0x68] sm:$0xff] }
 0x347   :  { %v1345_v18 = vadd.f32 %v1313_v43, %v2386_v25  ;;  %1412 = vrot.lane.b32.xlu0 %v1344_v16, %s1949_s2 }
 0x349   :  { %1414 = vrot.lane.b32.xlu1 %v1345_v18, %s1949_s2 }
 0x34e   :  { %v1233_v20 = vpop.permute.xlu0 %1232 }
 0x34f   :  { %v1318_v5 = vmul.f32 %v1233_v20, %v1158_v19  ;;  %v1166_v19 = vld [vmem:[%s2875_s7 + $0x90] sm:$0xff] }
 0x350   :  { %v1235_v26 = vpop.permute.xlu1 %1234 }
 0x351   :  { %v1350_v29 = vadd.f32 %v1318_v5, %v2393_v36  ;;  %v1319_v31 = vmul.f32 %v1235_v26, %v1159_v22  ;;  %v1167_v22 = vld [vmem:[%s2875_s7 + $0x98] sm:$0xff] }
 0x352   :  { %v1229_v32 = vpop.permute.xlu0 %1228 }
 0x353   :  { %v1351_v34 = vadd.f32 %v1319_v31, %v2401_v45  ;;  %v1316_v35 = vmul.f32 %v1229_v32, %v1156_v28  ;;  %1424 = vrot.lane.b32.xlu0 %v1350_v29, %s1949_s2  ;;  %v1164_v28 = vld [vmem:[%s2875_s7 + $0x80] sm:$0xff] }
 0x354   :  { %v1231_v37 = vpop.permute.xlu1 %1230 }
 0x355   :  { %v1348_v40 = vadd.f32 %v1316_v35, %v2396_v39  ;;  %v1317_v44 = vmul.f32 %v1231_v37, %v1157_v33  ;;  %1426 = vrot.lane.b32.xlu1 %v1351_v34, %s1949_s2  ;;  %v1165_v33 = vld [vmem:[%s2875_s7 + $0x88] sm:$0xff] }
 0x357   :  { %v1349_v50 = vadd.f32 %v1317_v44, %v2405_v49  ;;  %1420 = vrot.lane.b32.xlu0 %v1348_v40, %s1949_s2 }
 0x359   :  { %1422 = vrot.lane.b32.xlu1 %v1349_v50, %s1949_s2 }
 0x35e   :  { %v1241_v53 = vpop.permute.xlu0 %1240 }
 0x35f   :  { %v1322_v57 = vmul.f32 %v1241_v53, %v1162_v52  ;;  %v1170_v52 = vld [vmem:[%s2875_s7 + $0xb0] sm:$0xff] }
 0x360   :  { %v1243_v61 = vpop.permute.xlu1 %1242 }
 0x361   :  { %v1354_v0 = vadd.f32 %v1322_v57, %v2413_v60  ;;  %v1323_v3 = vmul.f32 %v1243_v61, %v1163_v56  ;;  %v1171_v56 = vld [vmem:[%s2875_s7 + $0xb8] sm:$0xff] }
 0x362   :  { %v1237_v9 = vpop.permute.xlu0 %1236 }
 0x363   :  { %v1355_v13 = vadd.f32 %v1323_v3, %v2421_v6  ;;  %v1320_v15 = vmul.f32 %v1237_v9, %v1160_v63  ;;  %1432 = vrot.lane.b32.xlu0 %v1354_v0, %s1949_s2  ;;  %v1168_v63 = vld [vmem:[%s2875_s7 + $0xa0] sm:$0xff] }
 0x364   :  { %v1239_v2 = vpop.permute.xlu1 %1238 }
 0x365   :  { %v1352_v16 = vadd.f32 %v1320_v15, %v2416_v62  ;;  %v1321_v43 = vmul.f32 %v1239_v2, %v1161_v11  ;;  %1434 = vrot.lane.b32.xlu1 %v1355_v13, %s1949_s2  ;;  %v1169_v11 = vld [vmem:[%s2875_s7 + $0xa8] sm:$0xff] }
 0x367   :  { %v1353_v18 = vadd.f32 %v1321_v43, %v2425_v12  ;;  %1428 = vrot.lane.b32.xlu0 %v1352_v16, %s1949_s2 }
 0x369   :  { %1430 = vrot.lane.b32.xlu1 %v1353_v18, %s1949_s2 }
 0x36e   :  { %v1249_v20 = vpop.permute.xlu0 %1248 }
 0x36f   :  { %v1326_v5 = vmul.f32 %v1249_v20, %v1166_v19  ;;  %v1174_v19 = vld [vmem:[%s2875_s7 + $0xd0] sm:$0xff] }
 0x370   :  { %v1251_v26 = vpop.permute.xlu1 %1250 }
 0x371   :  { %v1358_v29 = vadd.f32 %v1326_v5, %v2433_v41  ;;  %v1327_v31 = vmul.f32 %v1251_v26, %v1167_v22  ;;  %v1175_v22 = vld [vmem:[%s2875_s7 + $0xd8] sm:$0xff] }
 0x372   :  { %v1245_v32 = vpop.permute.xlu0 %1244 }
 0x373   :  { %v1359_v34 = vadd.f32 %v1327_v31, %v2441_v27  ;;  %v1324_v35 = vmul.f32 %v1245_v32, %v1164_v28  ;;  %1440 = vrot.lane.b32.xlu0 %v1358_v29, %s1949_s2  ;;  %v1172_v28 = vld [vmem:[%s2875_s7 + $0xc0] sm:$0xff] }
 0x374   :  { %v1247_v37 = vpop.permute.xlu1 %1246 }
 0x375   :  { %v1356_v40 = vadd.f32 %v1324_v35, %v2436_v1  ;;  %v1325_v44 = vmul.f32 %v1247_v37, %v1165_v33  ;;  %1442 = vrot.lane.b32.xlu1 %v1359_v34, %s1949_s2  ;;  %v1173_v33 = vld [vmem:[%s2875_s7 + $0xc8] sm:$0xff] }
 0x377   :  { %v1357_v50 = vadd.f32 %v1325_v44, %v2445_v30  ;;  %1436 = vrot.lane.b32.xlu0 %v1356_v40, %s1949_s2 }
 0x379   :  { %1438 = vrot.lane.b32.xlu1 %v1357_v50, %s1949_s2 }
 0x37e   :  { %v1257_v53 = vpop.permute.xlu0 %1256 }
 0x37f   :  { %v1330_v57 = vmul.f32 %v1257_v53, %v1170_v52 }
 0x380   :  { %v1259_v61 = vpop.permute.xlu1 %1258 }
 0x381   :  { %v1362_v0 = vadd.f32 %v1330_v57, %v2453_v48  ;;  %v1331_v3 = vmul.f32 %v1259_v61, %v1171_v56  ;;  %v1176_v56 = vld [vmem:[%s2875_s7 + $0xe0] sm:$0xff]  ;;  %v1178_v57 = vld [vmem:[%s2875_s7 + $0xf0] sm:$0xff] }
 0x382   :  { %v1253_v9 = vpop.permute.xlu0 %1252 }
 0x383   :  { %v1363_v13 = vadd.f32 %v1331_v3, %v2461_v55  ;;  %v1328_v15 = vmul.f32 %v1253_v9, %v1168_v63  ;;  %1448 = vrot.lane.b32.xlu0 %v1362_v0, %s1949_s2  ;;  %v1177_v63 = vld [vmem:[%s2875_s7 + $0xe8] sm:$0xff]  ;;  %v1179_v3 = vld [vmem:[%s2875_s7 + $0xf8] sm:$0xff] }
 0x384   :  { %v1255_v2 = vpop.permute.xlu1 %1254 }
 0x385   :  { %v1360_v16 = vadd.f32 %v1328_v15, %v2456_v51  ;;  %v1329_v43 = vmul.f32 %v1255_v2, %v1169_v11  ;;  %1450 = vrot.lane.b32.xlu1 %v1363_v13, %s1949_s2 }
 0x387   :  { %v1361_v18 = vadd.f32 %v1329_v43, %v2465_v58  ;;  %1444 = vrot.lane.b32.xlu0 %v1360_v16, %s1949_s2 }
 0x389   :  { %1446 = vrot.lane.b32.xlu1 %v1361_v18, %s1949_s2 }
 0x38e   :  { %v1265_v20 = vpop.permute.xlu0 %1264 }
 0x38f   :  { %v1334_v5 = vmul.f32 %v1265_v20, %v1174_v19 }
 0x390   :  { %v1267_v26 = vpop.permute.xlu1 %1266 }
 0x391   :  { %v1366_v29 = vadd.f32 %v1334_v5, %v2473_v47  ;;  %v1335_v31 = vmul.f32 %v1267_v26, %v1175_v22 }
 0x392   :  { %v1261_v32 = vpop.permute.xlu0 %1260 }
 0x393   :  { %v1367_v34 = vadd.f32 %v1335_v31, %v2481_v21  ;;  %v1332_v35 = vmul.f32 %v1261_v32, %v1172_v28  ;;  %1456 = vrot.lane.b32.xlu0 %v1366_v29, %s1949_s2 }
 0x394   :  { %v1263_v37 = vpop.permute.xlu1 %1262 }
 0x395   :  { %v1364_v40 = vadd.f32 %v1332_v35, %v2476_v17  ;;  %v1333_v44 = vmul.f32 %v1263_v37, %v1173_v33  ;;  %1458 = vrot.lane.b32.xlu1 %v1367_v34, %s1949_s2 }
 0x397   :  { %v1365_v50 = vadd.f32 %v1333_v44, %v2485_v24  ;;  %1452 = vrot.lane.b32.xlu0 %v1364_v40, %s1949_s2 }
 0x399   :  { %1454 = vrot.lane.b32.xlu1 %v1365_v50, %s1949_s2 }
 0x39e   :  { %v1273_v52 = vpop.permute.xlu0 %1272 }
 0x39f   :  { %v1338_v11 = vmul.f32 %v1273_v52, %v1178_v57 }
 0x3a0   :  { %v1275_v53 = vpop.permute.xlu1 %1274 }
 0x3a1   :  { %v1339_v16 = vmul.f32 %v1275_v53, %v1179_v3  ;;  %v1370_v20 = vadd.f32 %v1338_v11, %v2493_v42 }
 0x3a2   :  { %v1269_v61 = vpop.permute.xlu0 %1268 }
 0x3a3   :  { %v1336_v0 = vmul.f32 %v1269_v61, %v1176_v56  ;;  %v1371_v28 = vadd.f32 %v1339_v16, %v2501_v54 }
 0x3a4   :  { %v1271_v9 = vpop.permute.xlu1 %1270 }
 0x3a5   :  { %v1368_v13 = vadd.f32 %v1336_v0, %v2496_v46  ;;  %v1337_v15 = vmul.f32 %v1271_v9, %v1177_v63 }
 0x3a6   :  { %v1409_v2 = vpop.permute.xlu0 %1408 }
 0x3a7   :  { %v1369_v43 = vadd.f32 %v1337_v15, %v2505_v59  ;;  %v1503_v18 = vsel %vm1500_vm1, %v2357_v4, %v1409_v2  ;;  %1460 = vrot.lane.b32.xlu0 %v1368_v13, %s1949_s2 }
 0x3a8   :  { %v1536_v19 = vsel %vm1533_vm2, %v1503_v18, 0.0 }
 0x3a9   :  { %1568 = vst [vmem:[%s2876_s8 + $0x10] sm:$0xff] %v1536_v19  ;;  %v1411_v22 = vpop.permute.xlu1 %1410  ;;  %1462 = vrot.lane.b32.xlu1 %v1369_v43, %s1949_s2 }
 0x3aa   :  { %v1504_v5 = vsel %vm1500_vm1, %v2364_v10, %v1411_v22  ;;  %v1405_v26 = vpop.permute.xlu0 %1404 }
 0x3ab   :  { %v1537_v4 = vsel %vm1533_vm2, %v1504_v5, 0.0  ;;  %v1501_v29 = vsel %vm1500_vm1, %v2360_v7, %v1405_v26  ;;  %1464 = vrot.lane.b32.xlu0 %v1370_v20, %s1949_s2 }
 0x3ac   :  { %1569 = vst [vmem:[%s2876_s8 + $0x18] sm:$0xff] %v1537_v4  ;;  %v1534_v31 = vsel %vm1533_vm2, %v1501_v29, 0.0 }
 0x3ad   :  { %1566 = vst [vmem:[%s2876_s8] sm:$0xff] %v1534_v31  ;;  %1466 = vrot.lane.b32.xlu1 %v1371_v28, %s1949_s2  ;;  %v1407_v10 = vpop.permute.xlu1 %1406 }
 0x3ae   :  { %v1502_v32 = vsel %vm1500_vm1, %v2368_v14, %v1407_v10 }
 0x3af   :  { %v1535_v7 = vsel %vm1533_vm2, %v1502_v32, 0.0 }
 0x3b0   :  { %1567 = vst [vmem:[%s2876_s8 + $0x8] sm:$0xff] %v1535_v7 }
 0x3b5   :  { %v1417_v33 = vpop.permute.xlu0 %1416 }
 0x3b6   :  { %v1507_v34 = vsel %vm1500_vm1, %v2373_v8, %v1417_v33 }
 0x3b7   :  { %v1540_v35 = vsel %vm1533_vm2, %v1507_v34, 0.0  ;;  %v1419_v37 = vpop.permute.xlu1 %1418 }
 0x3b8   :  { %1572 = vst [vmem:[%s2876_s8 + $0x30] sm:$0xff] %v1540_v35  ;;  %v1508_v14 = vsel %vm1500_vm1, %v2381_v23, %v1419_v37 }
 0x3b9   :  { %v1541_v40 = vsel %vm1533_vm2, %v1508_v14, 0.0  ;;  %v1413_v44 = vpop.permute.xlu0 %1412 }
 0x3ba   :  { %1573 = vst [vmem:[%s2876_s8 + $0x38] sm:$0xff] %v1541_v40  ;;  %v1505_v8 = vsel %vm1500_vm1, %v2376_v38, %v1413_v44 }
 0x3bb   :  { %v1538_v50 = vsel %vm1533_vm2, %v1505_v8, 0.0  ;;  %v1415_v52 = vpop.permute.xlu1 %1414 }
 0x3bc   :  { %1570 = vst [vmem:[%s2876_s8 + $0x20] sm:$0xff] %v1538_v50  ;;  %v1506_v23 = vsel %vm1500_vm1, %v2386_v25, %v1415_v52 }
 0x3bd   :  { %v1539_v53 = vsel %vm1533_vm2, %v1506_v23, 0.0 }
 0x3be   :  { %1571 = vst [vmem:[%s2876_s8 + $0x28] sm:$0xff] %v1539_v53 }
 0x3c5   :  { %v1425_v56 = vpop.permute.xlu0 %1424 }
 0x3c6   :  { %v1511_v38 = vsel %vm1500_vm1, %v2393_v36, %v1425_v56 }
 0x3c7   :  { %v1544_v57 = vsel %vm1533_vm2, %v1511_v38, 0.0  ;;  %v1427_v61 = vpop.permute.xlu1 %1426 }
 0x3c8   :  { %1576 = vst [vmem:[%s2876_s8 + $0x50] sm:$0xff] %v1544_v57  ;;  %v1512_v25 = vsel %vm1500_vm1, %v2401_v45, %v1427_v61 }
 0x3c9   :  { %v1545_v63 = vsel %vm1533_vm2, %v1512_v25, 0.0  ;;  %v1421_v0 = vpop.permute.xlu0 %1420 }
 0x3ca   :  { %1577 = vst [vmem:[%s2876_s8 + $0x58] sm:$0xff] %v1545_v63  ;;  %v1509_v36 = vsel %vm1500_vm1, %v2396_v39, %v1421_v0 }
 0x3cb   :  { %v1542_v3 = vsel %vm1533_vm2, %v1509_v36, 0.0  ;;  %v1423_v9 = vpop.permute.xlu1 %1422 }
 0x3cc   :  { %1574 = vst [vmem:[%s2876_s8 + $0x40] sm:$0xff] %v1542_v3  ;;  %v1510_v45 = vsel %vm1500_vm1, %v2405_v49, %v1423_v9 }
 0x3cd   :  { %v1543_v11 = vsel %vm1533_vm2, %v1510_v45, 0.0 }
 0x3ce   :  { %1575 = vst [vmem:[%s2876_s8 + $0x48] sm:$0xff] %v1543_v11 }
 0x3d5   :  { %v1433_v13 = vpop.permute.xlu0 %1432 }
 0x3d6   :  { %v1515_v39 = vsel %vm1500_vm1, %v2413_v60, %v1433_v13 }
 0x3d7   :  { %v1548_v15 = vsel %vm1533_vm2, %v1515_v39, 0.0  ;;  %v1435_v2 = vpop.permute.xlu1 %1434 }
 0x3d8   :  { %1580 = vst [vmem:[%s2876_s8 + $0x70] sm:$0xff] %v1548_v15  ;;  %v1516_v49 = vsel %vm1500_vm1, %v2421_v6, %v1435_v2 }
 0x3d9   :  { %v1549_v16 = vsel %vm1533_vm2, %v1516_v49, 0.0  ;;  %v1429_v43 = vpop.permute.xlu0 %1428 }
 0x3da   :  { %1581 = vst [vmem:[%s2876_s8 + $0x78] sm:$0xff] %v1549_v16  ;;  %v1513_v60 = vsel %vm1500_vm1, %v2416_v62, %v1429_v43 }
 0x3db   :  { %v1546_v18 = vsel %vm1533_vm2, %v1513_v60, 0.0  ;;  %v1431_v19 = vpop.permute.xlu1 %1430 }
 0x3dc   :  { %1578 = vst [vmem:[%s2876_s8 + $0x60] sm:$0xff] %v1546_v18  ;;  %v1514_v6 = vsel %vm1500_vm1, %v2425_v12, %v1431_v19 }
 0x3dd   :  { %v1547_v20 = vsel %vm1533_vm2, %v1514_v6, 0.0 }
 0x3de   :  { %1579 = vst [vmem:[%s2876_s8 + $0x68] sm:$0xff] %v1547_v20 }
 0x3e5   :  { %v1441_v22 = vpop.permute.xlu0 %1440 }
 0x3e6   :  { %v1519_v62 = vsel %vm1500_vm1, %v2433_v41, %v1441_v22 }
 0x3e7   :  { %v1552_v5 = vsel %vm1533_vm2, %v1519_v62, 0.0  ;;  %v1443_v26 = vpop.permute.xlu1 %1442 }
 0x3e8   :  { %1584 = vst [vmem:[%s2876_s8 + $0x90] sm:$0xff] %v1552_v5  ;;  %v1520_v12 = vsel %vm1500_vm1, %v2441_v27, %v1443_v26 }
 0x3e9   :  { %v1553_v28 = vsel %vm1533_vm2, %v1520_v12, 0.0  ;;  %v1437_v4 = vpop.permute.xlu0 %1436 }
 0x3ea   :  { %1585 = vst [vmem:[%s2876_s8 + $0x98] sm:$0xff] %v1553_v28  ;;  %v1517_v41 = vsel %vm1500_vm1, %v2436_v1, %v1437_v4 }
 0x3eb   :  { %v1550_v29 = vsel %vm1533_vm2, %v1517_v41, 0.0  ;;  %v1439_v31 = vpop.permute.xlu1 %1438 }
 0x3ec   :  { %1582 = vst [vmem:[%s2876_s8 + $0x80] sm:$0xff] %v1550_v29  ;;  %v1518_v27 = vsel %vm1500_vm1, %v2445_v30, %v1439_v31 }
 0x3ed   :  { %v1551_v10 = vsel %vm1533_vm2, %v1518_v27, 0.0 }
 0x3ee   :  { %1583 = vst [vmem:[%s2876_s8 + $0x88] sm:$0xff] %v1551_v10 }
 0x3f5   :  { %v1449_v32 = vpop.permute.xlu0 %1448 }
 0x3f6   :  { %v1523_v1 = vsel %vm1500_vm1, %v2453_v48, %v1449_v32 }
 0x3f7   :  { %v1556_v7 = vsel %vm1533_vm2, %v1523_v1, 0.0  ;;  %v1451_v33 = vpop.permute.xlu1 %1450 }
 0x3f8   :  { %1588 = vst [vmem:[%s2876_s8 + $0xb0] sm:$0xff] %v1556_v7  ;;  %v1524_v30 = vsel %vm1500_vm1, %v2461_v55, %v1451_v33 }
 0x3f9   :  { %v1557_v34 = vsel %vm1533_vm2, %v1524_v30, 0.0  ;;  %v1445_v35 = vpop.permute.xlu0 %1444 }
 0x3fa   :  { %1589 = vst [vmem:[%s2876_s8 + $0xb8] sm:$0xff] %v1557_v34  ;;  %v1521_v48 = vsel %vm1500_vm1, %v2456_v51, %v1445_v35 }
 0x3fb   :  { %v1554_v37 = vsel %vm1533_vm2, %v1521_v48, 0.0  ;;  %v1447_v14 = vpop.permute.xlu1 %1446 }
 0x3fc   :  { %1586 = vst [vmem:[%s2876_s8 + $0xa0] sm:$0xff] %v1554_v37  ;;  %v1522_v55 = vsel %vm1500_vm1, %v2465_v58, %v1447_v14 }
 0x3fd   :  { %v1555_v40 = vsel %vm1533_vm2, %v1522_v55, 0.0 }
 0x3fe   :  { %1587 = vst [vmem:[%s2876_s8 + $0xa8] sm:$0xff] %v1555_v40 }
 0x405   :  { %v1457_v44 = vpop.permute.xlu0 %1456 }
 0x406   :  { %v1527_v51 = vsel %vm1500_vm1, %v2473_v47, %v1457_v44 }
 0x407   :  { %v1560_v8 = vsel %vm1533_vm2, %v1527_v51, 0.0  ;;  %v1459_v50 = vpop.permute.xlu1 %1458 }
 0x408   :  { %1592 = vst [vmem:[%s2876_s8 + $0xd0] sm:$0xff] %v1560_v8  ;;  %v1528_v58 = vsel %vm1500_vm1, %v2481_v21, %v1459_v50 }
 0x409   :  { %v1561_v52 = vsel %vm1533_vm2, %v1528_v58, 0.0  ;;  %v1453_v23 = vpop.permute.xlu0 %1452 }
 0x40a   :  { %1593 = vst [vmem:[%s2876_s8 + $0xd8] sm:$0xff] %v1561_v52  ;;  %v1525_v47 = vsel %vm1500_vm1, %v2476_v17, %v1453_v23 }
 0x40b   :  { %v1558_v53 = vsel %vm1533_vm2, %v1525_v47, 0.0  ;;  %v1455_v56 = vpop.permute.xlu1 %1454 }
 0x40c   :  { %1590 = vst [vmem:[%s2876_s8 + $0xc0] sm:$0xff] %v1558_v53  ;;  %v1526_v21 = vsel %vm1500_vm1, %v2485_v24, %v1455_v56 }
 0x40d   :  { %v1559_v38 = vsel %vm1533_vm2, %v1526_v21, 0.0 }
 0x40e   :  { %1591 = vst [vmem:[%s2876_s8 + $0xc8] sm:$0xff] %v1559_v38 }
 0x419   :  { %v1461_v57 = vpop.permute.xlu0 %1460 }
 0x41a   :  { %v1529_v17 = vsel %vm1500_vm1, %v2496_v46, %v1461_v57 }
 0x41b   :  { %v1562_v61 = vsel %vm1533_vm2, %v1529_v17, 0.0  ;;  %v1463_v25 = vpop.permute.xlu1 %1462 }
 0x41c   :  { %1594 = vst [vmem:[%s2876_s8 + $0xe0] sm:$0xff] %v1562_v61  ;;  %v1530_v24 = vsel %vm1500_vm1, %v2505_v59, %v1463_v25 }
 0x41d   :  { %v1563_v63 = vsel %vm1533_vm2, %v1530_v24, 0.0  ;;  %v1465_v0 = vpop.permute.xlu0 %1464 }
 0x41e   :  { %1595 = vst [vmem:[%s2876_s8 + $0xe8] sm:$0xff] %v1563_v63  ;;  %v1531_v46 = vsel %vm1500_vm1, %v2493_v42, %v1465_v0 }
 0x41f   :  { %v1564_v36 = vsel %vm1533_vm2, %v1531_v46, 0.0  ;;  %v1467_v3 = vpop.permute.xlu1 %1466 }
 0x420   :  { %1596 = vst [vmem:[%s2876_s8 + $0xf0] sm:$0xff] %v1564_v36  ;;  %v1532_v59 = vsel %vm1500_vm1, %v2501_v54, %v1467_v3 }
 0x421   :  { %v1565_v9 = vsel %vm1533_vm2, %v1532_v59, 0.0 }
 0x422   :  { %1597 = vst [vmem:[%s2876_s8 + $0xf8] sm:$0xff] %v1565_v9 }

</bundles_post_ra>
